<compile_context>
chip_gen: v7x
topology: tpu7x:2x2x1
jax: 0.10.0
libtpu: 0.0.40
codegen_flags: <defaults>
</compile_context>

<pallas_src>
import jax
import jax.numpy as jnp
from jax import lax
from jax.experimental import pallas as pl
from jax.experimental.pallas import tpu as pltpu


def lstm_kernel(xw_ref, whh_ref, who_ref, bo_ref, out_ref, h_ref, c_ref, hseq_ref):
    """One seq chunk of the LSTM recurrence + batched output head.

    xw_ref   : (seq_tile, 4*Hp)  precomputed x @ W_ih.T + b_ih + b_hh (gate-major, padded)
    whh_ref  : (Hp, 4*Hp)        hidden->gates weights (padded, gate-major columns)
    who_ref  : (Hp, Ip)          output head weights (padded)
    bo_ref   : (1, Ip)           output head bias (padded)
    out_ref  : (seq_tile, Ip)    logits for this chunk
    h_ref, c_ref : (1, Hp)       carried hidden / cell state (persist across grid)
    hseq_ref : (seq_tile, Hp)    staging buffer for h_t of every step in the chunk
    """
    seq_tile = xw_ref.shape[0]
    Hp = whh_ref.shape[0]

    @pl.when(pl.program_id(0) == 0)
    def _():
        h_ref[...] = jnp.zeros_like(h_ref)
        c_ref[...] = jnp.zeros_like(c_ref)

    whh = whh_ref[...]

    def step(t, carry):
        h, c = carry  # each (1, Hp) f32
        # Only matmul on the serial path: (1, Hp) @ (Hp, 4*Hp).
        gates = xw_ref[pl.ds(t, 1), :] + jnp.dot(
            h, whh, preferred_element_type=jnp.float32)
        i_g = jax.nn.sigmoid(gates[:, 0 * Hp:1 * Hp])
        f_g = jax.nn.sigmoid(gates[:, 1 * Hp:2 * Hp])
        g_g = jnp.tanh(gates[:, 2 * Hp:3 * Hp])
        o_g = jax.nn.sigmoid(gates[:, 3 * Hp:4 * Hp])
        c_new = f_g * c + i_g * g_g
        h_new = o_g * jnp.tanh(c_new)
        hseq_ref[pl.ds(t, 1), :] = h_new
        return (h_new, c_new)

    h_fin, c_fin = lax.fori_loop(
        0, seq_tile, step, (h_ref[...], c_ref[...]), unroll=8)
    h_ref[...] = h_fin
    c_ref[...] = c_fin

    # Batched output head: one MXU-shaped matmul + one lane-dense slab store.
    out_ref[...] = (
        jnp.dot(hseq_ref[...], who_ref[...], preferred_element_type=jnp.float32)
        + bo_ref[...]
    )


def _round_up(x, m):
    return ((x + m - 1) // m) * m


def my_lstm_forward(token_ids, params, input_size, hidden_size, *, seq_tile=256):
    """Mirrors MyLSTM.forward on the first call (self.hidden is None)."""
    w_ih, w_hh, b_ih, b_hh, w_ho, b_ho = params
    H, I = hidden_size, input_size
    Hp = _round_up(H, 128)   # pad hidden to full 128-lane slices
    Ip = _round_up(I, 128)   # pad head output for a lane-dense store

    seq = token_ids.shape[0]
    seq_tile = max(8, min(_round_up(seq_tile, 8), _round_up(seq, 8)))
    seq_pad = _round_up(seq, seq_tile)
    num_chunks = seq_pad // seq_tile

    # ---- Hoisted input projection (batched, off the serial critical path).
    # x is one-hot, so x @ W_ih.T == W_ih.T[token_ids]; fold both biases in.
    wih_t = w_ih.T                                            # (I, 4H), cols gate-major [i|f|g|o]
    xw = jnp.take(wih_t, token_ids, axis=0) + (b_ih + b_hh)   # (seq, 4H)

    # ---- Pad each gate to a full 128-lane slice and pad seq to the tile.
    xw = jnp.pad(xw.reshape(seq, 4, H),
                 ((0, seq_pad - seq), (0, 0), (0, Hp - H))).reshape(seq_pad, 4 * Hp)
    whh = jnp.pad(w_hh.T.reshape(H, 4, H),
                  ((0, Hp - H), (0, 0), (0, Hp - H))).reshape(Hp, 4 * Hp)
    who = jnp.pad(w_ho.T, ((0, Hp - H), (0, Ip - I)))         # (Hp, Ip)
    bo = jnp.pad(b_ho, (0, Ip - I)).reshape(1, Ip)            # (1, Ip)

    out = pl.pallas_call(
        lstm_kernel,
        out_shape=jax.ShapeDtypeStruct((seq_pad, Ip), jnp.float32),
        grid_spec=pltpu.PrefetchScalarGridSpec(
            num_scalar_prefetch=0,
            grid=(num_chunks,),
            in_specs=[
                pl.BlockSpec((seq_tile, 4 * Hp), lambda i: (i, 0)),  # xw chunk
                pl.BlockSpec((Hp, 4 * Hp), lambda i: (0, 0)),        # W_hh (resident)
                pl.BlockSpec((Hp, Ip), lambda i: (0, 0)),            # W_ho (resident)
                pl.BlockSpec((1, Ip), lambda i: (0, 0)),             # b_o  (resident)
            ],
            out_specs=pl.BlockSpec((seq_tile, Ip), lambda i: (i, 0)),
            scratch_shapes=[
                pltpu.VMEM((1, Hp), jnp.float32),         # h carry
                pltpu.VMEM((1, Hp), jnp.float32),         # c carry
                pltpu.VMEM((seq_tile, Hp), jnp.float32),  # staged h_t for the head
            ],
        ),
        compiler_params=pltpu.CompilerParams(
            # Strictly serial recurrence across chunks -> "arbitrary".
            dimension_semantics=("arbitrary",),
            vmem_limit_bytes=32 * 1024 * 1024,
        ),
    )(xw, whh, who, bo)

    # Strip padding, restore PyTorch batch_first shape (1, seq, input_size).
    return out[:seq, :I].reshape(1, seq, I)


def reference_forward(token_ids, params, input_size, hidden_size):
    """Pure-JAX reference of the same math, for verification."""
    w_ih, w_hh, b_ih, b_hh, w_ho, b_ho = params
    x = jax.nn.one_hot(token_ids, input_size, dtype=jnp.float32)
    H = hidden_size

    def step(carry, x_t):
        h, c = carry
        gates = x_t @ w_ih.T + b_ih + h @ w_hh.T + b_hh
        i_g = jax.nn.sigmoid(gates[0 * H:1 * H])
        f_g = jax.nn.sigmoid(gates[1 * H:2 * H])
        g_g = jnp.tanh(gates[2 * H:3 * H])
        o_g = jax.nn.sigmoid(gates[3 * H:4 * H])
        c_new = f_g * c + i_g * g_g
        h_new = o_g * jnp.tanh(c_new)
        return (h_new, c_new), h_new @ w_ho.T + b_ho

    init = (jnp.zeros((H,), jnp.float32), jnp.zeros((H,), jnp.float32))
    _, outs = lax.scan(step, init, x)
    return outs[None, :, :]


def init_params(key, input_size, hidden_size):
    """Deterministic init mimicking PyTorch's U(-1/sqrt(H), 1/sqrt(H))."""
    k = 1.0 / jnp.sqrt(jnp.asarray(hidden_size, jnp.float32))
    keys = jax.random.split(key, 6)
    w_ih = jax.random.uniform(keys[0], (4 * hidden_size, input_size), jnp.float32, -k, k)
    w_hh = jax.random.uniform(keys[1], (4 * hidden_size, hidden_size), jnp.float32, -k, k)
    b_ih = jax.random.uniform(keys[2], (4 * hidden_size,), jnp.float32, -k, k)
    b_hh = jax.random.uniform(keys[3], (4 * hidden_size,), jnp.float32, -k, k)
    w_ho = jax.random.uniform(keys[4], (input_size, hidden_size), jnp.float32, -k, k)
    b_ho = jax.random.uniform(keys[5], (input_size,), jnp.float32, -k, k)
    return (w_ih, w_hh, b_ih, b_hh, w_ho, b_ho)


if __name__ == "__main__":
    input_size = 32   # vocab size
    hidden_size = 32

    root = jax.random.PRNGKey(0)
    k_param, k_data1, k_data2 = jax.random.split(root, 3)
    params = init_params(k_param, input_size, hidden_size)

    # Small single-chunk case (matches the module's typical char-seq usage).
    seq = 8
    token_ids = jax.random.randint(k_data1, (seq,), 0, input_size, dtype=jnp.int32)
    out = jax.block_until_ready(
        my_lstm_forward(token_ids, params, input_size, hidden_size))
    ref = jax.block_until_ready(
        reference_forward(token_ids, params, input_size, hidden_size))
    assert out.shape == (1, seq, input_size), out.shape
    assert jnp.allclose(out, ref, atol=1e-5, rtol=1e-5), (
        float(jnp.max(jnp.abs(out - ref))))

    # Multi-chunk case: exercises the grid + h/c carry across seq tiles.
    seq2 = 40
    token_ids2 = jax.random.randint(k_data2, (seq2,), 0, input_size, dtype=jnp.int32)
    out2 = jax.block_until_ready(
        my_lstm_forward(token_ids2, params, input_size, hidden_size, seq_tile=16))
    ref2 = jax.block_until_ready(
        reference_forward(token_ids2, params, input_size, hidden_size))
    assert out2.shape == (1, seq2, input_size), out2.shape
    assert jnp.allclose(out2, ref2, atol=1e-5, rtol=1e-5), (
        float(jnp.max(jnp.abs(out2 - ref2))))

    print("KERNEL_OK")
</pallas_src>

<mosaic_0001>
module attributes {stable_mosaic.version = 11 : i64} {
  func.func @lstm_kernel(%arg0: i32, %arg1: memref<8x512xf32, #tpu.memory_space<vmem>>, %arg2: memref<128x512xf32, #tpu.memory_space<vmem>>, %arg3: memref<128x128xf32, #tpu.memory_space<vmem>>, %arg4: memref<1x128xf32, #tpu.memory_space<vmem>>, %arg5: memref<8x128xf32, #tpu.memory_space<vmem>>, %arg6: memref<1x128xf32, #tpu.memory_space<vmem>>, %arg7: memref<1x128xf32, #tpu.memory_space<vmem>>, %arg8: memref<8x128xf32, #tpu.memory_space<vmem>>) attributes {dimension_semantics = [#tpu.dimension_semantics<arbitrary>], iteration_bounds = array<i64: 1>, scalar_prefetch = 0 : i64, scratch_operands = 3 : i64, tpu.core_type = #tpu.core_type<tc>, window_params = [{transform_indices = @transform_0, window_bounds = array<i64: 8, 512>}, {pipeline_mode = #tpu.pipeline_mode<synchronous>, transform_indices = @transform_1, window_bounds = array<i64: 128, 512>}, {pipeline_mode = #tpu.pipeline_mode<synchronous>, transform_indices = @transform_2, window_bounds = array<i64: 128, 128>}, {pipeline_mode = #tpu.pipeline_mode<synchronous>, transform_indices = @transform_3, window_bounds = array<i64: 1, 128>}, {transform_indices = @transform_4, window_bounds = array<i64: 8, 128>}]} {
    %c0_i32 = arith.constant 0 : i32
    %0 = arith.cmpi eq, %arg0, %c0_i32 : i32
    %1 = arith.extui %0 : i1 to i32
    %c0_i32_0 = arith.constant 0 : i32
    %2 = arith.cmpi ne, %1, %c0_i32_0 : i32
    scf.if %2 {
      %cst_67 = arith.constant 0.000000e+00 : f32
      %263 = vector.broadcast %cst_67 : f32 to vector<1x128xf32>
      %c0_68 = arith.constant 0 : index
      %c0_69 = arith.constant 0 : index
      %264 = vector.load %arg6[%c0_68, %c0_69] : memref<1x128xf32, #tpu.memory_space<vmem>>, vector<1x128xf32>
      tpu.vector_store %arg6[%c0_68, %c0_69], %263 {strides = array<i32>} : memref<1x128xf32, #tpu.memory_space<vmem>>, vector<1x128xf32>,
      %cst_70 = arith.constant 0.000000e+00 : f32
      %265 = vector.broadcast %cst_70 : f32 to vector<1x128xf32>
      %c0_71 = arith.constant 0 : index
      %c0_72 = arith.constant 0 : index
      %266 = vector.load %arg7[%c0_71, %c0_72] : memref<1x128xf32, #tpu.memory_space<vmem>>, vector<1x128xf32>
      tpu.vector_store %arg7[%c0_71, %c0_72], %265 {strides = array<i32>} : memref<1x128xf32, #tpu.memory_space<vmem>>, vector<1x128xf32>,
    } else {
    }
    %c0 = arith.constant 0 : index
    %c0_1 = arith.constant 0 : index
    %3 = vector.load %arg2[%c0, %c0_1] : memref<128x512xf32, #tpu.memory_space<vmem>>, vector<128x512xf32>
    %c0_2 = arith.constant 0 : index
    %c0_3 = arith.constant 0 : index
    %4 = vector.load %arg6[%c0_2, %c0_3] : memref<1x128xf32, #tpu.memory_space<vmem>>, vector<1x128xf32>
    %c0_4 = arith.constant 0 : index
    %c0_5 = arith.constant 0 : index
    %5 = vector.load %arg7[%c0_4, %c0_5] : memref<1x128xf32, #tpu.memory_space<vmem>>, vector<1x128xf32>
    %c0_i32_6 = arith.constant 0 : i32
    %6 = arith.index_cast %c0_i32_6 : i32 to index
    %c0_7 = arith.constant 0 : index
    %7 = vector.load %arg1[%6, %c0_7] : memref<8x512xf32, #tpu.memory_space<vmem>>, vector<1x512xf32>
    %cst = arith.constant dense<0.000000e+00> : vector<1x512xf32>
    %8 = tpu.matmul %4, %3, %cst {dimension_numbers = #tpu.dot_dimension_numbers<[1], [0], [0], [1], [0, 0, 1, 1], [], []>} : vector<1x128xf32>, vector<128x512xf32>, vector<1x512xf32> -> vector<1x512xf32>
    %9 = arith.addf %7, %8 : vector<1x512xf32>
    %10 = vector.extract_strided_slice %9 {offsets = [0, 0], sizes = [1, 128], strides = [1, 1]} : vector<1x512xf32> to vector<1x128xf32>
    %11 = arith.negf %10 : vector<1x128xf32>
    %12 = math.exp %11 : vector<1x128xf32>
    %cst_8 = arith.constant 1.000000e+00 : f32
    %13 = vector.broadcast %cst_8 : f32 to vector<1x128xf32>
    %14 = arith.addf %13, %12 : vector<1x128xf32>
    %15 = arith.divf %13, %14 : vector<1x128xf32>
    %16 = vector.extract_strided_slice %9 {offsets = [0, 128], sizes = [1, 128], strides = [1, 1]} : vector<1x512xf32> to vector<1x128xf32>
    %17 = arith.negf %16 : vector<1x128xf32>
    %18 = math.exp %17 : vector<1x128xf32>
    %cst_9 = arith.constant 1.000000e+00 : f32
    %19 = vector.broadcast %cst_9 : f32 to vector<1x128xf32>
    %20 = arith.addf %19, %18 : vector<1x128xf32>
    %21 = arith.divf %19, %20 : vector<1x128xf32>
    %22 = vector.extract_strided_slice %9 {offsets = [0, 256], sizes = [1, 128], strides = [1, 1]} : vector<1x512xf32> to vector<1x128xf32>
    %23 = math.tanh %22 : vector<1x128xf32>
    %24 = vector.extract_strided_slice %9 {offsets = [0, 384], sizes = [1, 128], strides = [1, 1]} : vector<1x512xf32> to vector<1x128xf32>
    %25 = arith.negf %24 : vector<1x128xf32>
    %26 = math.exp %25 : vector<1x128xf32>
    %cst_10 = arith.constant 1.000000e+00 : f32
    %27 = vector.broadcast %cst_10 : f32 to vector<1x128xf32>
    %28 = arith.addf %27, %26 : vector<1x128xf32>
    %29 = arith.divf %27, %28 : vector<1x128xf32>
    %30 = arith.mulf %21, %5 : vector<1x128xf32>
    %31 = arith.mulf %15, %23 : vector<1x128xf32>
    %32 = arith.addf %30, %31 : vector<1x128xf32>
    %33 = math.tanh %32 : vector<1x128xf32>
    %34 = arith.mulf %29, %33 : vector<1x128xf32>
    %35 = arith.index_cast %c0_i32_6 : i32 to index
    %c0_11 = arith.constant 0 : index
    %36 = vector.load %arg8[%35, %c0_11] : memref<8x128xf32, #tpu.memory_space<vmem>>, vector<1x128xf32>
    tpu.vector_store %arg8[%35, %c0_11], %34 {strides = array<i32>} : memref<8x128xf32, #tpu.memory_space<vmem>>, vector<1x128xf32>,
    %c1_i32 = arith.constant 1 : i32
    %37 = arith.index_cast %c1_i32 : i32 to index
    %c0_12 = arith.constant 0 : index
    %38 = vector.load %arg1[%37, %c0_12] : memref<8x512xf32, #tpu.memory_space<vmem>>, vector<1x512xf32>
    %cst_13 = arith.constant dense<0.000000e+00> : vector<1x512xf32>
    %39 = tpu.matmul %34, %3, %cst_13 {dimension_numbers = #tpu.dot_dimension_numbers<[1], [0], [0], [1], [0, 0, 1, 1], [], []>} : vector<1x128xf32>, vector<128x512xf32>, vector<1x512xf32> -> vector<1x512xf32>
    %40 = arith.addf %38, %39 : vector<1x512xf32>
    %41 = vector.extract_strided_slice %40 {offsets = [0, 0], sizes = [1, 128], strides = [1, 1]} : vector<1x512xf32> to vector<1x128xf32>
    %42 = arith.negf %41 : vector<1x128xf32>
    %43 = math.exp %42 : vector<1x128xf32>
    %cst_14 = arith.constant 1.000000e+00 : f32
    %44 = vector.broadcast %cst_14 : f32 to vector<1x128xf32>
    %45 = arith.addf %44, %43 : vector<1x128xf32>
    %46 = arith.divf %44, %45 : vector<1x128xf32>
    %47 = vector.extract_strided_slice %40 {offsets = [0, 128], sizes = [1, 128], strides = [1, 1]} : vector<1x512xf32> to vector<1x128xf32>
    %48 = arith.negf %47 : vector<1x128xf32>
    %49 = math.exp %48 : vector<1x128xf32>
    %cst_15 = arith.constant 1.000000e+00 : f32
    %50 = vector.broadcast %cst_15 : f32 to vector<1x128xf32>
    %51 = arith.addf %50, %49 : vector<1x128xf32>
    %52 = arith.divf %50, %51 : vector<1x128xf32>
    %53 = vector.extract_strided_slice %40 {offsets = [0, 256], sizes = [1, 128], strides = [1, 1]} : vector<1x512xf32> to vector<1x128xf32>
    %54 = math.tanh %53 : vector<1x128xf32>
    %55 = vector.extract_strided_slice %40 {offsets = [0, 384], sizes = [1, 128], strides = [1, 1]} : vector<1x512xf32> to vector<1x128xf32>
    %56 = arith.negf %55 : vector<1x128xf32>
    %57 = math.exp %56 : vector<1x128xf32>
    %cst_16 = arith.constant 1.000000e+00 : f32
    %58 = vector.broadcast %cst_16 : f32 to vector<1x128xf32>
    %59 = arith.addf %58, %57 : vector<1x128xf32>
    %60 = arith.divf %58, %59 : vector<1x128xf32>
    %61 = arith.mulf %52, %32 : vector<1x128xf32>
    %62 = arith.mulf %46, %54 : vector<1x128xf32>
    %63 = arith.addf %61, %62 : vector<1x128xf32>
    %64 = math.tanh %63 : vector<1x128xf32>
    %65 = arith.mulf %60, %64 : vector<1x128xf32>
    %66 = arith.index_cast %c1_i32 : i32 to index
    %c0_17 = arith.constant 0 : index
    %67 = vector.load %arg8[%66, %c0_17] : memref<8x128xf32, #tpu.memory_space<vmem>>, vector<1x128xf32>
    tpu.vector_store %arg8[%66, %c0_17], %65 {strides = array<i32>} : memref<8x128xf32, #tpu.memory_space<vmem>>, vector<1x128xf32>,
    %c2_i32 = arith.constant 2 : i32
    %68 = arith.index_cast %c2_i32 : i32 to index
    %c0_18 = arith.constant 0 : index
    %69 = vector.load %arg1[%68, %c0_18] : memref<8x512xf32, #tpu.memory_space<vmem>>, vector<1x512xf32>
    %cst_19 = arith.constant dense<0.000000e+00> : vector<1x512xf32>
    %70 = tpu.matmul %65, %3, %cst_19 {dimension_numbers = #tpu.dot_dimension_numbers<[1], [0], [0], [1], [0, 0, 1, 1], [], []>} : vector<1x128xf32>, vector<128x512xf32>, vector<1x512xf32> -> vector<1x512xf32>
    %71 = arith.addf %69, %70 : vector<1x512xf32>
    %72 = vector.extract_strided_slice %71 {offsets = [0, 0], sizes = [1, 128], strides = [1, 1]} : vector<1x512xf32> to vector<1x128xf32>
    %73 = arith.negf %72 : vector<1x128xf32>
    %74 = math.exp %73 : vector<1x128xf32>
    %cst_20 = arith.constant 1.000000e+00 : f32
    %75 = vector.broadcast %cst_20 : f32 to vector<1x128xf32>
    %76 = arith.addf %75, %74 : vector<1x128xf32>
    %77 = arith.divf %75, %76 : vector<1x128xf32>
    %78 = vector.extract_strided_slice %71 {offsets = [0, 128], sizes = [1, 128], strides = [1, 1]} : vector<1x512xf32> to vector<1x128xf32>
    %79 = arith.negf %78 : vector<1x128xf32>
    %80 = math.exp %79 : vector<1x128xf32>
    %cst_21 = arith.constant 1.000000e+00 : f32
    %81 = vector.broadcast %cst_21 : f32 to vector<1x128xf32>
    %82 = arith.addf %81, %80 : vector<1x128xf32>
    %83 = arith.divf %81, %82 : vector<1x128xf32>
    %84 = vector.extract_strided_slice %71 {offsets = [0, 256], sizes = [1, 128], strides = [1, 1]} : vector<1x512xf32> to vector<1x128xf32>
    %85 = math.tanh %84 : vector<1x128xf32>
    %86 = vector.extract_strided_slice %71 {offsets = [0, 384], sizes = [1, 128], strides = [1, 1]} : vector<1x512xf32> to vector<1x128xf32>
    %87 = arith.negf %86 : vector<1x128xf32>
    %88 = math.exp %87 : vector<1x128xf32>
    %cst_22 = arith.constant 1.000000e+00 : f32
    %89 = vector.broadcast %cst_22 : f32 to vector<1x128xf32>
    %90 = arith.addf %89, %88 : vector<1x128xf32>
    %91 = arith.divf %89, %90 : vector<1x128xf32>
    %92 = arith.mulf %83, %63 : vector<1x128xf32>
    %93 = arith.mulf %77, %85 : vector<1x128xf32>
    %94 = arith.addf %92, %93 : vector<1x128xf32>
    %95 = math.tanh %94 : vector<1x128xf32>
    %96 = arith.mulf %91, %95 : vector<1x128xf32>
    %97 = arith.index_cast %c2_i32 : i32 to index
    %c0_23 = arith.constant 0 : index
    %98 = vector.load %arg8[%97, %c0_23] : memref<8x128xf32, #tpu.memory_space<vmem>>, vector<1x128xf32>
    tpu.vector_store %arg8[%97, %c0_23], %96 {strides = array<i32>} : memref<8x128xf32, #tpu.memory_space<vmem>>, vector<1x128xf32>,
    %c3_i32 = arith.constant 3 : i32
    %99 = arith.index_cast %c3_i32 : i32 to index
    %c0_24 = arith.constant 0 : index
    %100 = vector.load %arg1[%99, %c0_24] : memref<8x512xf32, #tpu.memory_space<vmem>>, vector<1x512xf32>
    %cst_25 = arith.constant dense<0.000000e+00> : vector<1x512xf32>
    %101 = tpu.matmul %96, %3, %cst_25 {dimension_numbers = #tpu.dot_dimension_numbers<[1], [0], [0], [1], [0, 0, 1, 1], [], []>} : vector<1x128xf32>, vector<128x512xf32>, vector<1x512xf32> -> vector<1x512xf32>
    %102 = arith.addf %100, %101 : vector<1x512xf32>
    %103 = vector.extract_strided_slice %102 {offsets = [0, 0], sizes = [1, 128], strides = [1, 1]} : vector<1x512xf32> to vector<1x128xf32>
    %104 = arith.negf %103 : vector<1x128xf32>
    %105 = math.exp %104 : vector<1x128xf32>
    %cst_26 = arith.constant 1.000000e+00 : f32
    %106 = vector.broadcast %cst_26 : f32 to vector<1x128xf32>
    %107 = arith.addf %106, %105 : vector<1x128xf32>
    %108 = arith.divf %106, %107 : vector<1x128xf32>
    %109 = vector.extract_strided_slice %102 {offsets = [0, 128], sizes = [1, 128], strides = [1, 1]} : vector<1x512xf32> to vector<1x128xf32>
    %110 = arith.negf %109 : vector<1x128xf32>
    %111 = math.exp %110 : vector<1x128xf32>
    %cst_27 = arith.constant 1.000000e+00 : f32
    %112 = vector.broadcast %cst_27 : f32 to vector<1x128xf32>
    %113 = arith.addf %112, %111 : vector<1x128xf32>
    %114 = arith.divf %112, %113 : vector<1x128xf32>
    %115 = vector.extract_strided_slice %102 {offsets = [0, 256], sizes = [1, 128], strides = [1, 1]} : vector<1x512xf32> to vector<1x128xf32>
    %116 = math.tanh %115 : vector<1x128xf32>
    %117 = vector.extract_strided_slice %102 {offsets = [0, 384], sizes = [1, 128], strides = [1, 1]} : vector<1x512xf32> to vector<1x128xf32>
    %118 = arith.negf %117 : vector<1x128xf32>
    %119 = math.exp %118 : vector<1x128xf32>
    %cst_28 = arith.constant 1.000000e+00 : f32
    %120 = vector.broadcast %cst_28 : f32 to vector<1x128xf32>
    %121 = arith.addf %120, %119 : vector<1x128xf32>
    %122 = arith.divf %120, %121 : vector<1x128xf32>
    %123 = arith.mulf %114, %94 : vector<1x128xf32>
    %124 = arith.mulf %108, %116 : vector<1x128xf32>
    %125 = arith.addf %123, %124 : vector<1x128xf32>
    %126 = math.tanh %125 : vector<1x128xf32>
    %127 = arith.mulf %122, %126 : vector<1x128xf32>
    %128 = arith.index_cast %c3_i32 : i32 to index
    %c0_29 = arith.constant 0 : index
    %129 = vector.load %arg8[%128, %c0_29] : memref<8x128xf32, #tpu.memory_space<vmem>>, vector<1x128xf32>
    tpu.vector_store %arg8[%128, %c0_29], %127 {strides = array<i32>} : memref<8x128xf32, #tpu.memory_space<vmem>>, vector<1x128xf32>,
    %c4_i32 = arith.constant 4 : i32
    %130 = arith.index_cast %c4_i32 : i32 to index
    %c0_30 = arith.constant 0 : index
    %131 = vector.load %arg1[%130, %c0_30] : memref<8x512xf32, #tpu.memory_space<vmem>>, vector<1x512xf32>
    %cst_31 = arith.constant dense<0.000000e+00> : vector<1x512xf32>
    %132 = tpu.matmul %127, %3, %cst_31 {dimension_numbers = #tpu.dot_dimension_numbers<[1], [0], [0], [1], [0, 0, 1, 1], [], []>} : vector<1x128xf32>, vector<128x512xf32>, vector<1x512xf32> -> vector<1x512xf32>
    %133 = arith.addf %131, %132 : vector<1x512xf32>
    %134 = vector.extract_strided_slice %133 {offsets = [0, 0], sizes = [1, 128], strides = [1, 1]} : vector<1x512xf32> to vector<1x128xf32>
    %135 = arith.negf %134 : vector<1x128xf32>
    %136 = math.exp %135 : vector<1x128xf32>
    %cst_32 = arith.constant 1.000000e+00 : f32
    %137 = vector.broadcast %cst_32 : f32 to vector<1x128xf32>
    %138 = arith.addf %137, %136 : vector<1x128xf32>
    %139 = arith.divf %137, %138 : vector<1x128xf32>
    %140 = vector.extract_strided_slice %133 {offsets = [0, 128], sizes = [1, 128], strides = [1, 1]} : vector<1x512xf32> to vector<1x128xf32>
    %141 = arith.negf %140 : vector<1x128xf32>
    %142 = math.exp %141 : vector<1x128xf32>
    %cst_33 = arith.constant 1.000000e+00 : f32
    %143 = vector.broadcast %cst_33 : f32 to vector<1x128xf32>
    %144 = arith.addf %143, %142 : vector<1x128xf32>
    %145 = arith.divf %143, %144 : vector<1x128xf32>
    %146 = vector.extract_strided_slice %133 {offsets = [0, 256], sizes = [1, 128], strides = [1, 1]} : vector<1x512xf32> to vector<1x128xf32>
    %147 = math.tanh %146 : vector<1x128xf32>
    %148 = vector.extract_strided_slice %133 {offsets = [0, 384], sizes = [1, 128], strides = [1, 1]} : vector<1x512xf32> to vector<1x128xf32>
    %149 = arith.negf %148 : vector<1x128xf32>
    %150 = math.exp %149 : vector<1x128xf32>
    %cst_34 = arith.constant 1.000000e+00 : f32
    %151 = vector.broadcast %cst_34 : f32 to vector<1x128xf32>
    %152 = arith.addf %151, %150 : vector<1x128xf32>
    %153 = arith.divf %151, %152 : vector<1x128xf32>
    %154 = arith.mulf %145, %125 : vector<1x128xf32>
    %155 = arith.mulf %139, %147 : vector<1x128xf32>
    %156 = arith.addf %154, %155 : vector<1x128xf32>
    %157 = math.tanh %156 : vector<1x128xf32>
    %158 = arith.mulf %153, %157 : vector<1x128xf32>
    %159 = arith.index_cast %c4_i32 : i32 to index
    %c0_35 = arith.constant 0 : index
    %160 = vector.load %arg8[%159, %c0_35] : memref<8x128xf32, #tpu.memory_space<vmem>>, vector<1x128xf32>
    tpu.vector_store %arg8[%159, %c0_35], %158 {strides = array<i32>} : memref<8x128xf32, #tpu.memory_space<vmem>>, vector<1x128xf32>,
    %c5_i32 = arith.constant 5 : i32
    %161 = arith.index_cast %c5_i32 : i32 to index
    %c0_36 = arith.constant 0 : index
    %162 = vector.load %arg1[%161, %c0_36] : memref<8x512xf32, #tpu.memory_space<vmem>>, vector<1x512xf32>
    %cst_37 = arith.constant dense<0.000000e+00> : vector<1x512xf32>
    %163 = tpu.matmul %158, %3, %cst_37 {dimension_numbers = #tpu.dot_dimension_numbers<[1], [0], [0], [1], [0, 0, 1, 1], [], []>} : vector<1x128xf32>, vector<128x512xf32>, vector<1x512xf32> -> vector<1x512xf32>
    %164 = arith.addf %162, %163 : vector<1x512xf32>
    %165 = vector.extract_strided_slice %164 {offsets = [0, 0], sizes = [1, 128], strides = [1, 1]} : vector<1x512xf32> to vector<1x128xf32>
    %166 = arith.negf %165 : vector<1x128xf32>
    %167 = math.exp %166 : vector<1x128xf32>
    %cst_38 = arith.constant 1.000000e+00 : f32
    %168 = vector.broadcast %cst_38 : f32 to vector<1x128xf32>
    %169 = arith.addf %168, %167 : vector<1x128xf32>
    %170 = arith.divf %168, %169 : vector<1x128xf32>
    %171 = vector.extract_strided_slice %164 {offsets = [0, 128], sizes = [1, 128], strides = [1, 1]} : vector<1x512xf32> to vector<1x128xf32>
    %172 = arith.negf %171 : vector<1x128xf32>
    %173 = math.exp %172 : vector<1x128xf32>
    %cst_39 = arith.constant 1.000000e+00 : f32
    %174 = vector.broadcast %cst_39 : f32 to vector<1x128xf32>
    %175 = arith.addf %174, %173 : vector<1x128xf32>
    %176 = arith.divf %174, %175 : vector<1x128xf32>
    %177 = vector.extract_strided_slice %164 {offsets = [0, 256], sizes = [1, 128], strides = [1, 1]} : vector<1x512xf32> to vector<1x128xf32>
    %178 = math.tanh %177 : vector<1x128xf32>
    %179 = vector.extract_strided_slice %164 {offsets = [0, 384], sizes = [1, 128], strides = [1, 1]} : vector<1x512xf32> to vector<1x128xf32>
    %180 = arith.negf %179 : vector<1x128xf32>
    %181 = math.exp %180 : vector<1x128xf32>
    %cst_40 = arith.constant 1.000000e+00 : f32
    %182 = vector.broadcast %cst_40 : f32 to vector<1x128xf32>
    %183 = arith.addf %182, %181 : vector<1x128xf32>
    %184 = arith.divf %182, %183 : vector<1x128xf32>
    %185 = arith.mulf %176, %156 : vector<1x128xf32>
    %186 = arith.mulf %170, %178 : vector<1x128xf32>
    %187 = arith.addf %185, %186 : vector<1x128xf32>
    %188 = math.tanh %187 : vector<1x128xf32>
    %189 = arith.mulf %184, %188 : vector<1x128xf32>
    %190 = arith.index_cast %c5_i32 : i32 to index
    %c0_41 = arith.constant 0 : index
    %191 = vector.load %arg8[%190, %c0_41] : memref<8x128xf32, #tpu.memory_space<vmem>>, vector<1x128xf32>
    tpu.vector_store %arg8[%190, %c0_41], %189 {strides = array<i32>} : memref<8x128xf32, #tpu.memory_space<vmem>>, vector<1x128xf32>,
    %c6_i32 = arith.constant 6 : i32
    %192 = arith.index_cast %c6_i32 : i32 to index
    %c0_42 = arith.constant 0 : index
    %193 = vector.load %arg1[%192, %c0_42] : memref<8x512xf32, #tpu.memory_space<vmem>>, vector<1x512xf32>
    %cst_43 = arith.constant dense<0.000000e+00> : vector<1x512xf32>
    %194 = tpu.matmul %189, %3, %cst_43 {dimension_numbers = #tpu.dot_dimension_numbers<[1], [0], [0], [1], [0, 0, 1, 1], [], []>} : vector<1x128xf32>, vector<128x512xf32>, vector<1x512xf32> -> vector<1x512xf32>
    %195 = arith.addf %193, %194 : vector<1x512xf32>
    %196 = vector.extract_strided_slice %195 {offsets = [0, 0], sizes = [1, 128], strides = [1, 1]} : vector<1x512xf32> to vector<1x128xf32>
    %197 = arith.negf %196 : vector<1x128xf32>
    %198 = math.exp %197 : vector<1x128xf32>
    %cst_44 = arith.constant 1.000000e+00 : f32
    %199 = vector.broadcast %cst_44 : f32 to vector<1x128xf32>
    %200 = arith.addf %199, %198 : vector<1x128xf32>
    %201 = arith.divf %199, %200 : vector<1x128xf32>
    %202 = vector.extract_strided_slice %195 {offsets = [0, 128], sizes = [1, 128], strides = [1, 1]} : vector<1x512xf32> to vector<1x128xf32>
    %203 = arith.negf %202 : vector<1x128xf32>
    %204 = math.exp %203 : vector<1x128xf32>
    %cst_45 = arith.constant 1.000000e+00 : f32
    %205 = vector.broadcast %cst_45 : f32 to vector<1x128xf32>
    %206 = arith.addf %205, %204 : vector<1x128xf32>
    %207 = arith.divf %205, %206 : vector<1x128xf32>
    %208 = vector.extract_strided_slice %195 {offsets = [0, 256], sizes = [1, 128], strides = [1, 1]} : vector<1x512xf32> to vector<1x128xf32>
    %209 = math.tanh %208 : vector<1x128xf32>
    %210 = vector.extract_strided_slice %195 {offsets = [0, 384], sizes = [1, 128], strides = [1, 1]} : vector<1x512xf32> to vector<1x128xf32>
    %211 = arith.negf %210 : vector<1x128xf32>
    %212 = math.exp %211 : vector<1x128xf32>
    %cst_46 = arith.constant 1.000000e+00 : f32
    %213 = vector.broadcast %cst_46 : f32 to vector<1x128xf32>
    %214 = arith.addf %213, %212 : vector<1x128xf32>
    %215 = arith.divf %213, %214 : vector<1x128xf32>
    %216 = arith.mulf %207, %187 : vector<1x128xf32>
    %217 = arith.mulf %201, %209 : vector<1x128xf32>
    %218 = arith.addf %216, %217 : vector<1x128xf32>
    %219 = math.tanh %218 : vector<1x128xf32>
    %220 = arith.mulf %215, %219 : vector<1x128xf32>
    %221 = arith.index_cast %c6_i32 : i32 to index
    %c0_47 = arith.constant 0 : index
    %222 = vector.load %arg8[%221, %c0_47] : memref<8x128xf32, #tpu.memory_space<vmem>>, vector<1x128xf32>
    tpu.vector_store %arg8[%221, %c0_47], %220 {strides = array<i32>} : memref<8x128xf32, #tpu.memory_space<vmem>>, vector<1x128xf32>,
    %c7_i32 = arith.constant 7 : i32
    %223 = arith.index_cast %c7_i32 : i32 to index
    %c0_48 = arith.constant 0 : index
    %224 = vector.load %arg1[%223, %c0_48] : memref<8x512xf32, #tpu.memory_space<vmem>>, vector<1x512xf32>
    %cst_49 = arith.constant dense<0.000000e+00> : vector<1x512xf32>
    %225 = tpu.matmul %220, %3, %cst_49 {dimension_numbers = #tpu.dot_dimension_numbers<[1], [0], [0], [1], [0, 0, 1, 1], [], []>} : vector<1x128xf32>, vector<128x512xf32>, vector<1x512xf32> -> vector<1x512xf32>
    %226 = arith.addf %224, %225 : vector<1x512xf32>
    %227 = vector.extract_strided_slice %226 {offsets = [0, 0], sizes = [1, 128], strides = [1, 1]} : vector<1x512xf32> to vector<1x128xf32>
    %228 = arith.negf %227 : vector<1x128xf32>
    %229 = math.exp %228 : vector<1x128xf32>
    %cst_50 = arith.constant 1.000000e+00 : f32
    %230 = vector.broadcast %cst_50 : f32 to vector<1x128xf32>
    %231 = arith.addf %230, %229 : vector<1x128xf32>
    %232 = arith.divf %230, %231 : vector<1x128xf32>
    %233 = vector.extract_strided_slice %226 {offsets = [0, 128], sizes = [1, 128], strides = [1, 1]} : vector<1x512xf32> to vector<1x128xf32>
    %234 = arith.negf %233 : vector<1x128xf32>
    %235 = math.exp %234 : vector<1x128xf32>
    %cst_51 = arith.constant 1.000000e+00 : f32
    %236 = vector.broadcast %cst_51 : f32 to vector<1x128xf32>
    %237 = arith.addf %236, %235 : vector<1x128xf32>
    %238 = arith.divf %236, %237 : vector<1x128xf32>
    %239 = vector.extract_strided_slice %226 {offsets = [0, 256], sizes = [1, 128], strides = [1, 1]} : vector<1x512xf32> to vector<1x128xf32>
    %240 = math.tanh %239 : vector<1x128xf32>
    %241 = vector.extract_strided_slice %226 {offsets = [0, 384], sizes = [1, 128], strides = [1, 1]} : vector<1x512xf32> to vector<1x128xf32>
    %242 = arith.negf %241 : vector<1x128xf32>
    %243 = math.exp %242 : vector<1x128xf32>
    %cst_52 = arith.constant 1.000000e+00 : f32
    %244 = vector.broadcast %cst_52 : f32 to vector<1x128xf32>
    %245 = arith.addf %244, %243 : vector<1x128xf32>
    %246 = arith.divf %244, %245 : vector<1x128xf32>
    %247 = arith.mulf %238, %218 : vector<1x128xf32>
    %248 = arith.mulf %232, %240 : vector<1x128xf32>
    %249 = arith.addf %247, %248 : vector<1x128xf32>
    %250 = math.tanh %249 : vector<1x128xf32>
    %251 = arith.mulf %246, %250 : vector<1x128xf32>
    %252 = arith.index_cast %c7_i32 : i32 to index
    %c0_53 = arith.constant 0 : index
    %253 = vector.load %arg8[%252, %c0_53] : memref<8x128xf32, #tpu.memory_space<vmem>>, vector<1x128xf32>
    tpu.vector_store %arg8[%252, %c0_53], %251 {strides = array<i32>} : memref<8x128xf32, #tpu.memory_space<vmem>>, vector<1x128xf32>,
    %c8_i32 = arith.constant 8 : i32
    %c0_54 = arith.constant 0 : index
    %c0_55 = arith.constant 0 : index
    %254 = vector.load %arg6[%c0_54, %c0_55] : memref<1x128xf32, #tpu.memory_space<vmem>>, vector<1x128xf32>
    tpu.vector_store %arg6[%c0_54, %c0_55], %251 {strides = array<i32>} : memref<1x128xf32, #tpu.memory_space<vmem>>, vector<1x128xf32>,
    %c0_56 = arith.constant 0 : index
    %c0_57 = arith.constant 0 : index
    %255 = vector.load %arg7[%c0_56, %c0_57] : memref<1x128xf32, #tpu.memory_space<vmem>>, vector<1x128xf32>
    tpu.vector_store %arg7[%c0_56, %c0_57], %249 {strides = array<i32>} : memref<1x128xf32, #tpu.memory_space<vmem>>, vector<1x128xf32>,
    %c0_58 = arith.constant 0 : index
    %c0_59 = arith.constant 0 : index
    %256 = vector.load %arg8[%c0_58, %c0_59] : memref<8x128xf32, #tpu.memory_space<vmem>>, vector<8x128xf32>
    %c0_60 = arith.constant 0 : index
    %c0_61 = arith.constant 0 : index
    %257 = vector.load %arg3[%c0_60, %c0_61] : memref<128x128xf32, #tpu.memory_space<vmem>>, vector<128x128xf32>
    %cst_62 = arith.constant dense<0.000000e+00> : vector<8x128xf32>
    %258 = tpu.matmul %256, %257, %cst_62 {dimension_numbers = #tpu.dot_dimension_numbers<[1], [0], [0], [1], [0, 0, 1, 1], [], []>} : vector<8x128xf32>, vector<128x128xf32>, vector<8x128xf32> -> vector<8x128xf32>
    %c0_63 = arith.constant 0 : index
    %c0_64 = arith.constant 0 : index
    %259 = vector.load %arg4[%c0_63, %c0_64] : memref<1x128xf32, #tpu.memory_space<vmem>>, vector<1x128xf32>
    %260 = vector.broadcast %259 : vector<1x128xf32> to vector<8x128xf32>
    %261 = arith.addf %258, %260 : vector<8x128xf32>
    %c0_65 = arith.constant 0 : index
    %c0_66 = arith.constant 0 : index
    %262 = vector.load %arg5[%c0_65, %c0_66] : memref<8x128xf32, #tpu.memory_space<vmem>>, vector<8x128xf32>
    tpu.vector_store %arg5[%c0_65, %c0_66], %261 {strides = array<i32>} : memref<8x128xf32, #tpu.memory_space<vmem>>, vector<8x128xf32>,
    return
  }
  func.func @transform_0(%arg0: i32) -> (i32, i32) {
    %c0_i32 = arith.constant 0 : i32
    %c0_i32_0 = arith.constant 0 : i32
    return %arg0, %c0_i32 : i32, i32
  }
  func.func @transform_1(%arg0: i32) -> (i32, i32) {
    %c0_i32 = arith.constant 0 : i32
    %c0_i32_0 = arith.constant 0 : i32
    %c0_i32_1 = arith.constant 0 : i32
    return %c0_i32, %c0_i32_0 : i32, i32
  }
  func.func @transform_2(%arg0: i32) -> (i32, i32) {
    %c0_i32 = arith.constant 0 : i32
    %c0_i32_0 = arith.constant 0 : i32
    %c0_i32_1 = arith.constant 0 : i32
    return %c0_i32, %c0_i32_0 : i32, i32
  }
  func.func @transform_3(%arg0: i32) -> (i32, i32) {
    %c0_i32 = arith.constant 0 : i32
    %c0_i32_0 = arith.constant 0 : i32
    %c0_i32_1 = arith.constant 0 : i32
    return %c0_i32, %c0_i32_0 : i32, i32
  }
  func.func @transform_4(%arg0: i32) -> (i32, i32) {
    %c0_i32 = arith.constant 0 : i32
    %c0_i32_0 = arith.constant 0 : i32
    return %arg0, %c0_i32 : i32, i32
  }
}

</mosaic_0001>

<bundles_post_ra>
// kernel: tpu_custom_call.1
= control target key start
LH: loop header
LB: loop body
LE: loop exit
PB: predicated region body
PF: predicated region fallthrough
CT: control target
= control target key end

     0   :  { %9 = vsyncpa [#allocation6], 0  ;;  %s3217_s0 = inlined_call_operand.hbm [shape: f32[8,512], index: 0, kind: input, shape index: {}]   ;;  %s3218_s1 = inlined_call_operand.hbm [shape: f32[128,512], index: 1, kind: input, shape index: {}]   ;;  %s3219_s2 = inlined_call_operand.hbm [shape: f32[128,128], index: 2, kind: input, shape index: {}]   ;;  %s3220_s3 = inlined_call_operand.vmem [shape: f32[1,128], index: 3, kind: input, shape index: {}]   ;;  %s3221_s4 = inlined_call_operand.hbm [shape: f32[8,128], index: 4, kind: output, shape index: {}]  }
   0x1   :  { %10 = vsyncpa [#allocation9], 0 }
   0x2   :  { %11 = vsyncpa [#allocation7], 0  ;;  %s2736_s15 = smov [#allocation8]   ;;  %s2642_s19 = scalar_lea.hbm %s3218_s1, 8192 }
   0x3   :  { %s27_s16 = sshll.u32 %s2736_s15, 4  ;;  %p2643_p0 = scmp.ne.s32.totalorder %s3218_s1, %s2642_s19  ;;  %s28_s16 = int_to_ptr.vmem [resolvable:$true] %s27_s16 }
   0x4   :  { %p2646_p1 = scmp.lt.u32.totalorder %s2642_s19, %s3218_s1 }
   0x6   :  { %p2648_p2 = pnand %p2646_p1, %p2643_p0 }
   0x8   :  { %2651 = shalt.err (!%p2648_p2)
}
   0x9   :  { %s2652_s24 = scalar_lea.vmem %s28_s16, 8192  ;;  %p2657_p4 = scmp.lt.s32.totalorder %s28_s16, %s28_s16 }
   0xa   :  { %p2653_p3 = scmp.ne.s32.totalorder %s28_s16, %s2652_s24  ;;  %p2658_p5 = scmp.lt.s32.totalorder %s2652_s24, %s2652_s24 }
   0xc   :  { %p2659_p6 = por %p2658_p5, %p2657_p4 }
   0xe   :  { %p2660_p7 = pnand %p2659_p6, %p2653_p3 }
  0x10   :  { %2663 = shalt.err (!%p2660_p7)
}
  0x11   :  { %s2737_s25 = smov 512   ;;  %s2738_s26 = smov 32  }
  0x12   :  { %33 = dma.hbm_to_vmem [thread:$0]  %s3218_s1, 8192, %s28_s16, [#allocation9], %s2737_s25, %s2737_s25, %s2738_s26  }
  0x13   :  { %s2739_s29 = smov [#allocation5]   ;;  %s2740_s5 = smov [#allocation10]  }
  0x14   :  { %s18_s30 = sshll.u32 %s2739_s29, 4  ;;  %s39_s6 = sshll.u32 %s2740_s5, 4  ;;  %s19_s30 = int_to_ptr.vmem [resolvable:$true] %s18_s30  ;;  %s40_s6 = int_to_ptr.vmem [resolvable:$true] %s39_s6 }
  0x15   :  { %s2664_s9 = scalar_lea.hbm %s3217_s0, 512 }
  0x16   :  { %p2665_p8 = scmp.ne.s32.totalorder %s3217_s0, %s2664_s9  ;;  %p2668_p9 = scmp.lt.u32.totalorder %s2664_s9, %s3217_s0 }
  0x18   :  { %p2670_p10 = pnand %p2668_p9, %p2665_p8 }
  0x1a   :  { %2673 = shalt.err (!%p2670_p10)
}
  0x1b   :  { %s2674_s1 = scalar_lea.vmem %s19_s30, 512  ;;  %p2679_p12 = scmp.lt.s32.totalorder %s19_s30, %s19_s30 }
  0x1c   :  { %p2675_p11 = scmp.ne.s32.totalorder %s19_s30, %s2674_s1  ;;  %p2680_p13 = scmp.lt.s32.totalorder %s2674_s1, %s2674_s1 }
  0x1e   :  { %p2681_p0 = por %p2680_p13, %p2679_p12 }
  0x20   :  { %p2682_p1 = pnand %p2681_p0, %p2675_p11 }
  0x22   :  { %2685 = shalt.err (!%p2682_p1)
}
  0x23   :  { %21 = dma.hbm_to_vmem [thread:$0]  %s3217_s0, 512, %s19_s30, [#allocation6]  }
  0x24   :  { %s2686_s18 = scalar_lea.hbm %s3219_s2, 2048 }
  0x25   :  { %p2687_p2 = scmp.ne.s32.totalorder %s3219_s2, %s2686_s18  ;;  %p2690_p3 = scmp.lt.u32.totalorder %s2686_s18, %s3219_s2 }
  0x27   :  { %p2692_p4 = pnand %p2690_p3, %p2687_p2 }
  0x29   :  { %2695 = shalt.err (!%p2692_p4)
}
  0x2a   :  { %s2696_s23 = scalar_lea.vmem %s40_s6, 2048  ;;  %p2701_p6 = scmp.lt.s32.totalorder %s40_s6, %s40_s6 }
  0x2b   :  { %p2697_p5 = scmp.ne.s32.totalorder %s40_s6, %s2696_s23  ;;  %p2702_p7 = scmp.lt.s32.totalorder %s2696_s23, %s2696_s23 }
  0x2d   :  { %p2703_p8 = por %p2702_p7, %p2701_p6 }
  0x2f   :  { %p2704_p9 = pnand %p2703_p8, %p2697_p5 }
  0x31   :  { %2707 = shalt.err (!%p2704_p9)
}
  0x32   :  { %s2741_s0 = smov 128   ;;  %s2742_s24 = smov 8  }
  0x33   :  { %45 = dma.hbm_to_vmem [thread:$0]  %s3219_s2, 2048, %s40_s6, [#allocation9], %s2741_s0, %s2741_s0, %s2742_s24  }
  0x34   :  { %2730 = dma.done.wait [#allocation6], 512  }
  0x35   :  { %2731 = vsyncadd [#allocation6], 4294966784 }
  0x36   :  { %2732 = dma.done.wait [#allocation9], 10240  }
  0x37   :  { %2733 = vsyncadd [#allocation9], 4294957056  ;;  %v2743_v0 = vmov 0.0   ;;  %v64_v1 = vld [vmem:[#allocation8 + $0x8] sm:$0xff]  ;;  %v66_v3 = vld [vmem:[#allocation8 + $0x18] sm:$0xff]  ;;  %vm2746_vm0 = vmmov 0  }
  0x38   :  { %194 = vmatprep.mubr.f32.mxu0 %v2743_v0  ;;  %61 = vst [vmem:[#allocation2] sm:$0x1] %v2743_v0  ;;  %62 = vst [vmem:[#allocation3] sm:$0x1] %v2743_v0  ;;  %265 = vmatprep.mubr.f32.mxu1 %v2743_v0  ;;  %v68_v2 = vld [vmem:[#allocation8 + $0x28] sm:$0xff]  ;;  %v70_v5 = vld [vmem:[#allocation8 + $0x38] sm:$0xff] }
  0x39   :  { %v2813_v4 = vpack.c.bf16 %v68_v2, %v64_v1  ;;  %v63_v6 = vld [vmem:[#allocation8] sm:$0xff]  ;;  %v2815_v8 = vpack.c.bf16 %v70_v5, %v66_v3  ;;  %v65_v10 = vld [vmem:[#allocation8 + $0x10] sm:$0xff]  ;;  %v72_v12 = vld [vmem:[#allocation8 + $0x48] sm:$0xff]  ;;  %s2747_s28 = smov [#allocation11]  }
  0x3a   :  { %v67_v7 = vld [vmem:[#allocation8 + $0x20] sm:$0xff]  ;;  %v69_v11 = vld [vmem:[#allocation8 + $0x30] sm:$0xff]  ;;  %v76_v14 = vld [vmem:[#allocation8 + $0x68] sm:$0xff]  ;;  %s1879_s29 = sshll.u32 %s2747_s28, 4  ;;  %s1880_s29 = int_to_ptr.vmem [resolvable:$true] %s1879_s29 }
  0x3b   :  { %v2817_v9 = vpack.c.bf16 %v67_v7, %v63_v6  ;;  %1967 = vmatprep.subr.bf16.mxu0 %v2813_v4  ;;  %v2820_v13 = vpack.c.bf16 %v69_v11, %v65_v10  ;;  %v74_v15 = vld [vmem:[#allocation8 + $0x58] sm:$0xff]  ;;  %1999 = vmatprep.subr.bf16.mxu1 %v2815_v8  ;;  %v2824_v17 = vpack.c.bf16 %v76_v14, %v72_v12  ;;  %v71_v19 = vld [vmem:[#allocation8 + $0x40] sm:$0xff]  ;;  %v73_v21 = vld [vmem:[#allocation8 + $0x50] sm:$0xff]  ;;  %s2708_s30 = scalar_lea.vmem %s1880_s29, 128  ;;  %p2713_p11 = scmp.lt.s32.totalorder %s1880_s29, %s1880_s29 }
  0x3c   :  { %v78_v16 = vld [vmem:[#allocation8 + $0x78] sm:$0xff]  ;;  %v75_v20 = vld [vmem:[#allocation8 + $0x60] sm:$0xff]  ;;  %v77_v23 = vld [vmem:[#allocation8 + $0x70] sm:$0xff]  ;;  %p2709_p10 = scmp.ne.s32.totalorder %s1880_s29, %s2708_s30  ;;  %p2714_p12 = scmp.lt.s32.totalorder %s2708_s30, %s2708_s30 }
  0x3d   :  { %1969 = vmatpush1.bf16.msra.mxu0 %v2817_v9  ;;  %v2826_v18 = vpack.c.bf16 %v78_v16, %v74_v15  ;;  %2001 = vmatpush1.bf16.msra.mxu1 %v2820_v13  ;;  %v2829_v22 = vpack.c.bf16 %v75_v20, %v71_v19  ;;  %v80_v24 = vld [vmem:[#allocation8 + $0x88] sm:$0xff]  ;;  %v2833_v26 = vpack.c.bf16 %v77_v23, %v73_v21  ;;  %v82_v28 = vld [vmem:[#allocation8 + $0x98] sm:$0xff]  ;;  %v79_v30 = vld [vmem:[#allocation8 + $0x80] sm:$0xff] }
  0x3e   :  { %v84_v25 = vld [vmem:[#allocation8 + $0xa8] sm:$0xff]  ;;  %1971 = vmatprep.subr.bf16.mxu0 %v2824_v17  ;;  %v86_v29 = vld [vmem:[#allocation8 + $0xb8] sm:$0xff]  ;;  %v83_v32 = vld [vmem:[#allocation8 + $0xa0] sm:$0xff]  ;;  %p2715_p13 = por %p2714_p12, %p2713_p11 }
  0x3f   :  { %2003 = vmatprep.subr.bf16.mxu1 %v2826_v18  ;;  %v2835_v27 = vpack.c.bf16 %v84_v25, %v80_v24  ;;  %v2837_v31 = vpack.c.bf16 %v86_v29, %v82_v28  ;;  %v81_v33 = vld [vmem:[#allocation8 + $0x90] sm:$0xff]  ;;  %v2840_v35 = vpack.c.bf16 %v83_v32, %v79_v30  ;;  %v88_v36 = vld [vmem:[#allocation8 + $0xc8] sm:$0xff]  ;;  %v90_v38 = vld [vmem:[#allocation8 + $0xd8] sm:$0xff] }
  0x40   :  { %v85_v34 = vld [vmem:[#allocation8 + $0xb0] sm:$0xff]  ;;  %v92_v37 = vld [vmem:[#allocation8 + $0xe8] sm:$0xff]  ;;  %v94_v41 = vld [vmem:[#allocation8 + $0xf8] sm:$0xff]  ;;  %p2716_p0 = pnand %p2715_p13, %p2709_p10 }
  0x41   :  { %1973 = vmatpush1.bf16.msra.mxu0 %v2829_v22  ;;  %2005 = vmatpush1.bf16.msra.mxu1 %v2833_v26  ;;  %v2844_v39 = vpack.c.bf16 %v85_v34, %v81_v33  ;;  %v2846_v40 = vpack.c.bf16 %v92_v37, %v88_v36  ;;  %v87_v42 = vld [vmem:[#allocation8 + $0xc0] sm:$0xff]  ;;  %v2849_v44 = vpack.c.bf16 %v94_v41, %v90_v38  ;;  %v89_v45 = vld [vmem:[#allocation8 + $0xd0] sm:$0xff]  ;;  %v96_v47 = vld [vmem:[#allocation8 + $0x108] sm:$0xff] }
  0x42   :  { %1975 = vmatprep.subr.bf16.mxu0 %v2835_v27  ;;  %v91_v43 = vld [vmem:[#allocation8 + $0xe0] sm:$0xff]  ;;  %2007 = vmatprep.subr.bf16.mxu1 %v2837_v31  ;;  %v93_v46 = vld [vmem:[#allocation8 + $0xf0] sm:$0xff]  ;;  %v100_v48 = vld [vmem:[#allocation8 + $0x128] sm:$0xff] }
  0x43   :  { %v98_v49 = vld [vmem:[#allocation8 + $0x118] sm:$0xff]  ;;  %v2852_v51 = vpack.c.bf16 %v91_v43, %v87_v42  ;;  %v2856_v52 = vpack.c.bf16 %v93_v46, %v89_v45  ;;  %v2858_v53 = vpack.c.bf16 %v100_v48, %v96_v47  ;;  %v95_v54 = vld [vmem:[#allocation8 + $0x100] sm:$0xff]  ;;  %v97_v56 = vld [vmem:[#allocation8 + $0x110] sm:$0xff] }
  0x44   :  { %v102_v50 = vld [vmem:[#allocation8 + $0x138] sm:$0xff]  ;;  %v99_v55 = vld [vmem:[#allocation8 + $0x120] sm:$0xff]  ;;  %v101_v58 = vld [vmem:[#allocation8 + $0x130] sm:$0xff] }
  0x45   :  { %1977 = vmatpush1.bf16.msra.mxu0 %v2840_v35  ;;  %2009 = vmatpush1.bf16.msra.mxu1 %v2844_v39  ;;  %v2861_v57 = vpack.c.bf16 %v102_v50, %v98_v49  ;;  %v104_v59 = vld [vmem:[#allocation8 + $0x148] sm:$0xff]  ;;  %v106_v61 = vld [vmem:[#allocation8 + $0x158] sm:$0xff]  ;;  %v2864_v63 = vpack.c.bf16 %v99_v55, %v95_v54  ;;  %v2868_v1 = vpack.c.bf16 %v101_v58, %v97_v56  ;;  %v103_v3 = vld [vmem:[#allocation8 + $0x140] sm:$0xff]  ;;  %v2744_v49 = vmov 1966171168  }
  0x46   :  { %1979 = vmatprep.subr.bf16.mxu0 %v2846_v40  ;;  %2011 = vmatprep.subr.bf16.mxu1 %v2849_v44  ;;  %v108_v60 = vld [vmem:[#allocation8 + $0x168] sm:$0xff]  ;;  %v110_v62 = vld [vmem:[#allocation8 + $0x178] sm:$0xff]  ;;  %v107_v5 = vld [vmem:[#allocation8 + $0x160] sm:$0xff]  ;;  %v279_v50 = vunpack.c.l.s4 %v2744_v49  ;;  %v281_v54 = vlaneseq }
  0x47   :  { %v2870_v2 = vpack.c.bf16 %v108_v60, %v104_v59  ;;  %v105_v6 = vld [vmem:[#allocation8 + $0x150] sm:$0xff]  ;;  %v2873_v7 = vpack.c.bf16 %v110_v62, %v106_v61  ;;  %v112_v11 = vld [vmem:[#allocation8 + $0x188] sm:$0xff]  ;;  %v114_v14 = vld [vmem:[#allocation8 + $0x198] sm:$0xff]  ;;  %v2876_v16 = vpack.c.bf16 %v107_v5, %v103_v3 }
  0x48   :  { %v109_v10 = vld [vmem:[#allocation8 + $0x170] sm:$0xff]  ;;  %v116_v12 = vld [vmem:[#allocation8 + $0x1a8] sm:$0xff]  ;;  %v118_v15 = vld [vmem:[#allocation8 + $0x1b8] sm:$0xff]  ;;  %v280_v55 = vunpack.c.0.s8 %v279_v50  ;;  %v282_v56 = vshrl.u32 %v281_v54, 7 }
  0x49   :  { %1981 = vmatpush1.bf16.msra.mxu0 %v2852_v51  ;;  %2013 = vmatpush1.bf16.msra.mxu1 %v2856_v52  ;;  %v2880_v19 = vpack.c.bf16 %v109_v10, %v105_v6  ;;  %v2882_v20 = vpack.c.bf16 %v116_v12, %v112_v11  ;;  %v111_v21 = vld [vmem:[#allocation8 + $0x180] sm:$0xff]  ;;  %v113_v24 = vld [vmem:[#allocation8 + $0x190] sm:$0xff]  ;;  %v2885_v25 = vpack.c.bf16 %v118_v15, %v114_v14  ;;  %v120_v29 = vld [vmem:[#allocation8 + $0x1c8] sm:$0xff] }
  0x4a   :  { %1983 = vmatprep.subr.bf16.mxu0 %v2858_v53  ;;  %2015 = vmatprep.subr.bf16.mxu1 %v2861_v57  ;;  %v115_v23 = vld [vmem:[#allocation8 + $0x1a0] sm:$0xff]  ;;  %v117_v28 = vld [vmem:[#allocation8 + $0x1b0] sm:$0xff]  ;;  %v124_v30 = vld [vmem:[#allocation8 + $0x1e8] sm:$0xff]  ;;  %v2945_v59 = vsub.s32 %v280_v55, %v282_v56 }
  0x4b   :  { %v122_v32 = vld [vmem:[#allocation8 + $0x1d8] sm:$0xff]  ;;  %v2888_v34 = vpack.c.bf16 %v115_v23, %v111_v21  ;;  %v2892_v36 = vpack.c.bf16 %v117_v28, %v113_v24  ;;  %v2894_v37 = vpack.c.bf16 %v124_v30, %v120_v29  ;;  %v119_v38 = vld [vmem:[#allocation8 + $0x1c0] sm:$0xff]  ;;  %v121_v43 = vld [vmem:[#allocation8 + $0x1d0] sm:$0xff] }
  0x4c   :  { %v126_v33 = vld [vmem:[#allocation8 + $0x1f8] sm:$0xff]  ;;  %v123_v41 = vld [vmem:[#allocation8 + $0x1e0] sm:$0xff]  ;;  %v125_v45 = vld [vmem:[#allocation8 + $0x1f0] sm:$0xff] }
  0x4d   :  { %1985 = vmatpush1.bf16.msra.mxu0 %v2864_v63  ;;  %2017 = vmatpush1.bf16.msra.mxu1 %v2868_v1  ;;  %v2897_v42 = vpack.c.bf16 %v126_v33, %v122_v32  ;;  %v2900_v46 = vpack.c.bf16 %v123_v41, %v119_v38  ;;  %v2904_v47 = vpack.c.bf16 %v125_v45, %v121_v43  ;;  %v127_v48 = vld [vmem:[#allocation2] sm:$0x1]  ;;  %v129_v12 = vld [vmem:[#allocation5] ss:$8 sm:$0xf] }
  0x4e   :  { %1987 = vmatprep.subr.bf16.mxu0 %v2870_v2  ;;  %2019 = vmatprep.subr.bf16.mxu1 %v2873_v7 }
  0x51   :  { %1989 = vmatpush1.bf16.msra.mxu0 %v2876_v16  ;;  %2021 = vmatpush1.bf16.msra.mxu1 %v2880_v19 }
  0x52   :  { %1991 = vmatprep.subr.bf16.mxu0 %v2882_v20  ;;  %2023 = vmatprep.subr.bf16.mxu1 %v2885_v25 }
  0x55   :  { %1993 = vmatpush1.bf16.msra.mxu0 %v2888_v34  ;;  %2025 = vmatpush1.bf16.msra.mxu1 %v2892_v36 }
  0x56   :  { %1995 = vmatprep.subr.bf16.mxu0 %v2894_v37  ;;  %2027 = vmatprep.subr.bf16.mxu1 %v2897_v42 }
  0x59   :  { %1997 = vmatpush1.bf16.msra.mxu0 %v2900_v46  ;;  %2029 = vmatpush1.bf16.msra.mxu1 %v2904_v47 }
  0x5a   :  { %2031 = vmatprep.subr.bf16.mxu0 %v2813_v4  ;;  %2063 = vmatprep.subr.bf16.mxu1 %v2815_v8 }
  0x5c   :  { %195 = vmatmul.mubr.f32.vlgmr.msra.gmra.mrb[0].mxu0 %v127_v48  ;;  %266 = vmatmul.mubr.f32.vlgmr.msra.gmra.mrb[0].mxu1 %v127_v48  ;;  %v128_v48 = vld [vmem:[#allocation3] sm:$0x1] }
  0x5d   :  { %2033 = vmatpush1.bf16.msra.mxu0 %v2817_v9  ;;  %2065 = vmatpush1.bf16.msra.mxu1 %v2820_v13 }
  0x5e   :  { %2035 = vmatprep.subr.bf16.mxu0 %v2824_v17  ;;  %2067 = vmatprep.subr.bf16.mxu1 %v2826_v18 }
  0x5f   :  { %400 = vmatprep.mubr.f32.mxu0 %v2743_v0  ;;  %471 = vmatprep.mubr.f32.mxu1 %v2743_v0 }
  0x61   :  { %2037 = vmatpush1.bf16.msra.mxu0 %v2829_v22  ;;  %2069 = vmatpush1.bf16.msra.mxu1 %v2833_v26 }
  0x62   :  { %2039 = vmatprep.subr.bf16.mxu0 %v2835_v27  ;;  %2071 = vmatprep.subr.bf16.mxu1 %v2837_v31 }
  0x65   :  { %2041 = vmatpush1.bf16.msra.mxu0 %v2840_v35  ;;  %2073 = vmatpush1.bf16.msra.mxu1 %v2844_v39 }
  0x66   :  { %2043 = vmatprep.subr.bf16.mxu0 %v2846_v40  ;;  %2075 = vmatprep.subr.bf16.mxu1 %v2849_v44 }
  0x69   :  { %2045 = vmatpush1.bf16.msra.mxu0 %v2852_v51  ;;  %2077 = vmatpush1.bf16.msra.mxu1 %v2856_v52 }
  0x6a   :  { %2047 = vmatprep.subr.bf16.mxu0 %v2858_v53  ;;  %2079 = vmatprep.subr.bf16.mxu1 %v2861_v57 }
  0x6d   :  { %2049 = vmatpush1.bf16.msra.mxu0 %v2864_v63  ;;  %2081 = vmatpush1.bf16.msra.mxu1 %v2868_v1 }
  0x6e   :  { %2051 = vmatprep.subr.bf16.mxu0 %v2870_v2  ;;  %2083 = vmatprep.subr.bf16.mxu1 %v2873_v7 }
  0x71   :  { %2053 = vmatpush1.bf16.msra.mxu0 %v2876_v16  ;;  %2085 = vmatpush1.bf16.msra.mxu1 %v2880_v19 }
  0x72   :  { %2055 = vmatprep.subr.bf16.mxu0 %v2882_v20  ;;  %2087 = vmatprep.subr.bf16.mxu1 %v2885_v25 }
  0x75   :  { %2057 = vmatpush1.bf16.msra.mxu0 %v2888_v34  ;;  %2089 = vmatpush1.bf16.msra.mxu1 %v2892_v36 }
  0x76   :  { %2059 = vmatprep.subr.bf16.mxu0 %v2894_v37  ;;  %2091 = vmatprep.subr.bf16.mxu1 %v2897_v42 }
  0x79   :  { %2061 = vmatpush1.bf16.msra.mxu0 %v2900_v46  ;;  %2093 = vmatpush1.bf16.msra.mxu1 %v2904_v47 }
  0x7a   :  { %2095 = vmatprep.subr.bf16.mxu0 %v2813_v4  ;;  %2127 = vmatprep.subr.bf16.mxu1 %v2815_v8 }
 0x12f   :  { %v196_v58 = vpop.f32.mrb[0].mxu0  ;;  %v267_v60 = vpop.f32.mrb[0].mxu1 }
 0x130   :  { %v198_v61 = vpop.f32.mrb[1].mxu0  ;;  %v269_v3 = vpop.f32.mrb[1].mxu1 }
 0x131   :  { %v276_v62 = vcombine.low %v196_v58, %v198_v61  ;;  %v277_v5 = vcombine.low %v267_v60, %v269_v3 }
 0x133   :  { %v284_v6 = vrot.slane %v276_v62, %v2945_v59  ;;  %v291_v10 = vrot.slane %v277_v5, %v2945_v59 }
 0x135   :  { %v292_v11 = vcombine.low %v284_v6, %v291_v10 }
 0x137   :  { %v299_v14 = vrot.slane %v292_v11, %v2945_v59 }
 0x139   :  { %v301_v15 = vadd.f32 %v299_v14, %v129_v12 }
 0x13b   :  { %v1889_v21 = vmul.f32 -1.442695, %v301_v15  ;;  %v309_v23 = vrot.slane %v301_v15, 1  ;;  %v320_v28 = vrot.slane %v301_v15, 3  ;;  %v317_v32 = vrot.slane %v301_v15, 2 }
 0x13d   :  { %2514 = vpow2.f32 %v1889_v21  ;;  %v1890_v24 = vmul.f32 -1.442695, %v309_v23  ;;  %v1891_v29 = vmul.f32 -1.442695, %v320_v28 }
 0x13e   :  { %v335_v23 = vld [vmem:[#allocation5 + $0x1] ss:$8 sm:$0xf] }
 0x13f   :  { %2516 = vpow2.f32 %v1890_v24 }
 0x140   :  { %2518 = vpow2.f32 %v1891_v29 }
 0x147   :  { %v2515_v30 = vpop.eup %2514 }
 0x148   :  { %v305_v33 = vadd.f32 1.0, %v2515_v30 }
 0x149   :  { %v2517_v38 = vpop.eup %2516 }
 0x14a   :  { %2520 = vrcp.f32 %v305_v33  ;;  %v314_v41 = vadd.f32 1.0, %v2517_v38  ;;  %v2519_v43 = vpop.eup %2518 }
 0x14b   :  { %2522 = vtanh.f32 %v317_v32  ;;  %v325_v54 = vadd.f32 1.0, %v2519_v43 }
 0x14c   :  { %2524 = vrcp.f32 %v314_v41 }
 0x14d   :  { %2526 = vrcp.f32 %v325_v54 }
 0x154   :  { %v2521_v45 = vpop.eup %2520 }
 0x155   :  { %v2523_v49 = vpop.eup %2522 }
 0x156   :  { %v2525_v50 = vpop.eup %2524  ;;  %v329_v56 = vmul.f32 %v2523_v49, %v2521_v45 }
 0x157   :  { %v328_v55 = vmul.f32 %v2525_v50, %v128_v48  ;;  %v2527_v60 = vpop.eup %2526 }
 0x159   :  { %v2950_v58 = vadd.f32 %v329_v56, %v328_v55 }
 0x15b   :  { %2528 = vtanh.f32 %v2950_v58 }
 0x165   :  { %v2529_v61 = vpop.eup %2528 }
 0x166   :  { %v332_v62 = vmul.f32 %v2529_v61, %v2527_v60 }
 0x168   :  { %333 = vst [vmem:[#allocation4] sm:$0x1] %v332_v62  ;;  %401 = vmatmul.mubr.f32.vlgmr.msra.gmra.mrb[2].mxu0 %v332_v62  ;;  %472 = vmatmul.mubr.f32.vlgmr.msra.gmra.mrb[2].mxu1 %v332_v62 }
 0x169   :  { %2097 = vmatpush1.bf16.msra.mxu0 %v2817_v9  ;;  %2129 = vmatpush1.bf16.msra.mxu1 %v2820_v13 }
 0x16a   :  { %2099 = vmatprep.subr.bf16.mxu0 %v2824_v17  ;;  %2131 = vmatprep.subr.bf16.mxu1 %v2826_v18 }
 0x16b   :  { %606 = vmatprep.mubr.f32.mxu0 %v2743_v0  ;;  %677 = vmatprep.mubr.f32.mxu1 %v2743_v0 }
 0x16d   :  { %2101 = vmatpush1.bf16.msra.mxu0 %v2829_v22  ;;  %2133 = vmatpush1.bf16.msra.mxu1 %v2833_v26 }
 0x16e   :  { %2103 = vmatprep.subr.bf16.mxu0 %v2835_v27  ;;  %2135 = vmatprep.subr.bf16.mxu1 %v2837_v31 }
 0x171   :  { %2105 = vmatpush1.bf16.msra.mxu0 %v2840_v35  ;;  %2137 = vmatpush1.bf16.msra.mxu1 %v2844_v39 }
 0x172   :  { %2107 = vmatprep.subr.bf16.mxu0 %v2846_v40  ;;  %2139 = vmatprep.subr.bf16.mxu1 %v2849_v44 }
 0x175   :  { %2109 = vmatpush1.bf16.msra.mxu0 %v2852_v51  ;;  %2141 = vmatpush1.bf16.msra.mxu1 %v2856_v52 }
 0x176   :  { %2111 = vmatprep.subr.bf16.mxu0 %v2858_v53  ;;  %2143 = vmatprep.subr.bf16.mxu1 %v2861_v57 }
 0x179   :  { %2113 = vmatpush1.bf16.msra.mxu0 %v2864_v63  ;;  %2145 = vmatpush1.bf16.msra.mxu1 %v2868_v1 }
 0x17a   :  { %2115 = vmatprep.subr.bf16.mxu0 %v2870_v2  ;;  %2147 = vmatprep.subr.bf16.mxu1 %v2873_v7 }
 0x17d   :  { %2117 = vmatpush1.bf16.msra.mxu0 %v2876_v16  ;;  %2149 = vmatpush1.bf16.msra.mxu1 %v2880_v19 }
 0x17e   :  { %2119 = vmatprep.subr.bf16.mxu0 %v2882_v20  ;;  %2151 = vmatprep.subr.bf16.mxu1 %v2885_v25 }
 0x181   :  { %2121 = vmatpush1.bf16.msra.mxu0 %v2888_v34  ;;  %2153 = vmatpush1.bf16.msra.mxu1 %v2892_v36 }
 0x182   :  { %2123 = vmatprep.subr.bf16.mxu0 %v2894_v37  ;;  %2155 = vmatprep.subr.bf16.mxu1 %v2897_v42 }
 0x185   :  { %2125 = vmatpush1.bf16.msra.mxu0 %v2900_v46  ;;  %2157 = vmatpush1.bf16.msra.mxu1 %v2904_v47 }
 0x186   :  { %2159 = vmatprep.subr.bf16.mxu0 %v2813_v4  ;;  %2191 = vmatprep.subr.bf16.mxu1 %v2815_v8 }
 0x23b   :  { %v402_v3 = vpop.f32.mrb[2].mxu0  ;;  %v473_v5 = vpop.f32.mrb[2].mxu1 }
 0x23c   :  { %v404_v6 = vpop.f32.mrb[3].mxu0  ;;  %v475_v10 = vpop.f32.mrb[3].mxu1 }
 0x23d   :  { %v482_v11 = vcombine.low %v402_v3, %v404_v6  ;;  %v483_v12 = vcombine.low %v473_v5, %v475_v10 }
 0x23f   :  { %v490_v14 = vrot.slane %v482_v11, %v2945_v59  ;;  %v497_v15 = vrot.slane %v483_v12, %v2945_v59 }
 0x241   :  { %v498_v21 = vcombine.low %v490_v14, %v497_v15 }
 0x243   :  { %v505_v24 = vrot.slane %v498_v21, %v2945_v59 }
 0x245   :  { %v507_v28 = vadd.f32 %v505_v24, %v335_v23 }
 0x247   :  { %v1892_v29 = vmul.f32 -1.442695, %v507_v28  ;;  %v515_v30 = vrot.slane %v507_v28, 1  ;;  %v526_v33 = vrot.slane %v507_v28, 3  ;;  %v523_v43 = vrot.slane %v507_v28, 2 }
 0x249   :  { %2530 = vpow2.f32 %v1892_v29  ;;  %v1893_v32 = vmul.f32 -1.442695, %v515_v30  ;;  %v1894_v38 = vmul.f32 -1.442695, %v526_v33 }
 0x24a   :  { %v541_v29 = vld [vmem:[#allocation5 + $0x2] ss:$8 sm:$0xf] }
 0x24b   :  { %2532 = vpow2.f32 %v1893_v32 }
 0x24c   :  { %2534 = vpow2.f32 %v1894_v38 }
 0x253   :  { %v2531_v41 = vpop.eup %2530 }
 0x254   :  { %v511_v45 = vadd.f32 1.0, %v2531_v41 }
 0x255   :  { %v2533_v48 = vpop.eup %2532 }
 0x256   :  { %2536 = vrcp.f32 %v511_v45  ;;  %v520_v49 = vadd.f32 1.0, %v2533_v48  ;;  %v2535_v50 = vpop.eup %2534 }
 0x257   :  { %2538 = vtanh.f32 %v523_v43  ;;  %v531_v60 = vadd.f32 1.0, %v2535_v50 }
 0x258   :  { %2540 = vrcp.f32 %v520_v49 }
 0x259   :  { %2542 = vrcp.f32 %v531_v60 }
 0x260   :  { %v2537_v54 = vpop.eup %2536 }
 0x261   :  { %v2539_v55 = vpop.eup %2538 }
 0x262   :  { %v2541_v56 = vpop.eup %2540  ;;  %v535_v62 = vmul.f32 %v2539_v55, %v2537_v54 }
 0x263   :  { %v534_v61 = vmul.f32 %v2541_v56, %v2950_v58  ;;  %v2543_v5 = vpop.eup %2542 }
 0x265   :  { %v2991_v3 = vadd.f32 %v535_v62, %v534_v61 }
 0x267   :  { %2544 = vtanh.f32 %v2991_v3 }
 0x271   :  { %v2545_v6 = vpop.eup %2544 }
 0x272   :  { %v538_v10 = vmul.f32 %v2545_v6, %v2543_v5 }
 0x274   :  { %539 = vst [vmem:[#allocation4 + $0x1] sm:$0x1] %v538_v10  ;;  %607 = vmatmul.mubr.f32.vlgmr.msra.gmra.mrb[4].mxu0 %v538_v10  ;;  %678 = vmatmul.mubr.f32.vlgmr.msra.gmra.mrb[4].mxu1 %v538_v10 }
 0x275   :  { %2161 = vmatpush1.bf16.msra.mxu0 %v2817_v9  ;;  %2193 = vmatpush1.bf16.msra.mxu1 %v2820_v13 }
 0x276   :  { %2163 = vmatprep.subr.bf16.mxu0 %v2824_v17  ;;  %2195 = vmatprep.subr.bf16.mxu1 %v2826_v18 }
 0x277   :  { %812 = vmatprep.mubr.f32.mxu0 %v2743_v0  ;;  %883 = vmatprep.mubr.f32.mxu1 %v2743_v0 }
 0x279   :  { %2165 = vmatpush1.bf16.msra.mxu0 %v2829_v22  ;;  %2197 = vmatpush1.bf16.msra.mxu1 %v2833_v26 }
 0x27a   :  { %2167 = vmatprep.subr.bf16.mxu0 %v2835_v27  ;;  %2199 = vmatprep.subr.bf16.mxu1 %v2837_v31 }
 0x27d   :  { %2169 = vmatpush1.bf16.msra.mxu0 %v2840_v35  ;;  %2201 = vmatpush1.bf16.msra.mxu1 %v2844_v39 }
 0x27e   :  { %2171 = vmatprep.subr.bf16.mxu0 %v2846_v40  ;;  %2203 = vmatprep.subr.bf16.mxu1 %v2849_v44 }
 0x281   :  { %2173 = vmatpush1.bf16.msra.mxu0 %v2852_v51  ;;  %2205 = vmatpush1.bf16.msra.mxu1 %v2856_v52 }
 0x282   :  { %2175 = vmatprep.subr.bf16.mxu0 %v2858_v53  ;;  %2207 = vmatprep.subr.bf16.mxu1 %v2861_v57 }
 0x285   :  { %2177 = vmatpush1.bf16.msra.mxu0 %v2864_v63  ;;  %2209 = vmatpush1.bf16.msra.mxu1 %v2868_v1 }
 0x286   :  { %2179 = vmatprep.subr.bf16.mxu0 %v2870_v2  ;;  %2211 = vmatprep.subr.bf16.mxu1 %v2873_v7 }
 0x289   :  { %2181 = vmatpush1.bf16.msra.mxu0 %v2876_v16  ;;  %2213 = vmatpush1.bf16.msra.mxu1 %v2880_v19 }
 0x28a   :  { %2183 = vmatprep.subr.bf16.mxu0 %v2882_v20  ;;  %2215 = vmatprep.subr.bf16.mxu1 %v2885_v25 }
 0x28d   :  { %2185 = vmatpush1.bf16.msra.mxu0 %v2888_v34  ;;  %2217 = vmatpush1.bf16.msra.mxu1 %v2892_v36 }
 0x28e   :  { %2187 = vmatprep.subr.bf16.mxu0 %v2894_v37  ;;  %2219 = vmatprep.subr.bf16.mxu1 %v2897_v42 }
 0x291   :  { %2189 = vmatpush1.bf16.msra.mxu0 %v2900_v46  ;;  %2221 = vmatpush1.bf16.msra.mxu1 %v2904_v47 }
 0x292   :  { %2223 = vmatprep.subr.bf16.mxu0 %v2813_v4  ;;  %2255 = vmatprep.subr.bf16.mxu1 %v2815_v8 }
 0x347   :  { %v608_v58 = vpop.f32.mrb[4].mxu0  ;;  %v679_v11 = vpop.f32.mrb[4].mxu1 }
 0x348   :  { %v610_v12 = vpop.f32.mrb[5].mxu0  ;;  %v681_v14 = vpop.f32.mrb[5].mxu1 }
 0x349   :  { %v688_v15 = vcombine.low %v608_v58, %v610_v12  ;;  %v689_v21 = vcombine.low %v679_v11, %v681_v14 }
 0x34b   :  { %v696_v23 = vrot.slane %v688_v15, %v2945_v59  ;;  %v703_v24 = vrot.slane %v689_v21, %v2945_v59 }
 0x34d   :  { %v704_v28 = vcombine.low %v696_v23, %v703_v24 }
 0x34f   :  { %v711_v30 = vrot.slane %v704_v28, %v2945_v59 }
 0x351   :  { %v713_v32 = vadd.f32 %v711_v30, %v541_v29 }
 0x353   :  { %v1895_v33 = vmul.f32 -1.442695, %v713_v32  ;;  %v721_v38 = vrot.slane %v713_v32, 1  ;;  %v732_v43 = vrot.slane %v713_v32, 3  ;;  %v729_v49 = vrot.slane %v713_v32, 2 }
 0x355   :  { %2546 = vpow2.f32 %v1895_v33  ;;  %v1896_v41 = vmul.f32 -1.442695, %v721_v38  ;;  %v1897_v45 = vmul.f32 -1.442695, %v732_v43 }
 0x356   :  { %v747_v33 = vld [vmem:[#allocation5 + $0x3] ss:$8 sm:$0xf] }
 0x357   :  { %2548 = vpow2.f32 %v1896_v41 }
 0x358   :  { %2550 = vpow2.f32 %v1897_v45 }
 0x35f   :  { %v2547_v48 = vpop.eup %2546 }
 0x360   :  { %v717_v50 = vadd.f32 1.0, %v2547_v48 }
 0x361   :  { %v2549_v54 = vpop.eup %2548 }
 0x362   :  { %2552 = vrcp.f32 %v717_v50  ;;  %v726_v55 = vadd.f32 1.0, %v2549_v54  ;;  %v2551_v56 = vpop.eup %2550 }
 0x363   :  { %2554 = vtanh.f32 %v729_v49  ;;  %v737_v5 = vadd.f32 1.0, %v2551_v56 }
 0x364   :  { %2556 = vrcp.f32 %v726_v55 }
 0x365   :  { %2558 = vrcp.f32 %v737_v5 }
 0x36c   :  { %v2553_v60 = vpop.eup %2552 }
 0x36d   :  { %v2555_v61 = vpop.eup %2554 }
 0x36e   :  { %v2557_v62 = vpop.eup %2556  ;;  %v741_v10 = vmul.f32 %v2555_v61, %v2553_v60 }
 0x36f   :  { %v740_v6 = vmul.f32 %v2557_v62, %v2991_v3  ;;  %v2559_v11 = vpop.eup %2558 }
 0x371   :  { %v3032_v58 = vadd.f32 %v741_v10, %v740_v6 }
 0x373   :  { %2560 = vtanh.f32 %v3032_v58 }
 0x37d   :  { %v2561_v12 = vpop.eup %2560 }
 0x37e   :  { %v744_v14 = vmul.f32 %v2561_v12, %v2559_v11 }
 0x380   :  { %745 = vst [vmem:[#allocation4 + $0x2] sm:$0x1] %v744_v14  ;;  %813 = vmatmul.mubr.f32.vlgmr.msra.gmra.mrb[6].mxu0 %v744_v14  ;;  %884 = vmatmul.mubr.f32.vlgmr.msra.gmra.mrb[6].mxu1 %v744_v14 }
 0x381   :  { %2225 = vmatpush1.bf16.msra.mxu0 %v2817_v9  ;;  %2257 = vmatpush1.bf16.msra.mxu1 %v2820_v13 }
 0x382   :  { %2227 = vmatprep.subr.bf16.mxu0 %v2824_v17  ;;  %2259 = vmatprep.subr.bf16.mxu1 %v2826_v18 }
 0x383   :  { %1018 = vmatprep.mubr.f32.mxu0 %v2743_v0  ;;  %1089 = vmatprep.mubr.f32.mxu1 %v2743_v0 }
 0x385   :  { %2229 = vmatpush1.bf16.msra.mxu0 %v2829_v22  ;;  %2261 = vmatpush1.bf16.msra.mxu1 %v2833_v26 }
 0x386   :  { %2231 = vmatprep.subr.bf16.mxu0 %v2835_v27  ;;  %2263 = vmatprep.subr.bf16.mxu1 %v2837_v31 }
 0x389   :  { %2233 = vmatpush1.bf16.msra.mxu0 %v2840_v35  ;;  %2265 = vmatpush1.bf16.msra.mxu1 %v2844_v39 }
 0x38a   :  { %2235 = vmatprep.subr.bf16.mxu0 %v2846_v40  ;;  %2267 = vmatprep.subr.bf16.mxu1 %v2849_v44 }
 0x38d   :  { %2237 = vmatpush1.bf16.msra.mxu0 %v2852_v51  ;;  %2269 = vmatpush1.bf16.msra.mxu1 %v2856_v52 }
 0x38e   :  { %2239 = vmatprep.subr.bf16.mxu0 %v2858_v53  ;;  %2271 = vmatprep.subr.bf16.mxu1 %v2861_v57 }
 0x391   :  { %2241 = vmatpush1.bf16.msra.mxu0 %v2864_v63  ;;  %2273 = vmatpush1.bf16.msra.mxu1 %v2868_v1 }
 0x392   :  { %2243 = vmatprep.subr.bf16.mxu0 %v2870_v2  ;;  %2275 = vmatprep.subr.bf16.mxu1 %v2873_v7 }
 0x395   :  { %2245 = vmatpush1.bf16.msra.mxu0 %v2876_v16  ;;  %2277 = vmatpush1.bf16.msra.mxu1 %v2880_v19 }
 0x396   :  { %2247 = vmatprep.subr.bf16.mxu0 %v2882_v20  ;;  %2279 = vmatprep.subr.bf16.mxu1 %v2885_v25 }
 0x399   :  { %2249 = vmatpush1.bf16.msra.mxu0 %v2888_v34  ;;  %2281 = vmatpush1.bf16.msra.mxu1 %v2892_v36 }
 0x39a   :  { %2251 = vmatprep.subr.bf16.mxu0 %v2894_v37  ;;  %2283 = vmatprep.subr.bf16.mxu1 %v2897_v42 }
 0x39d   :  { %2253 = vmatpush1.bf16.msra.mxu0 %v2900_v46  ;;  %2285 = vmatpush1.bf16.msra.mxu1 %v2904_v47 }
 0x39e   :  { %2287 = vmatprep.subr.bf16.mxu0 %v2813_v4  ;;  %2319 = vmatprep.subr.bf16.mxu1 %v2815_v8 }
 0x453   :  { %v814_v3 = vpop.f32.mrb[6].mxu0  ;;  %v885_v15 = vpop.f32.mrb[6].mxu1 }
 0x454   :  { %v816_v21 = vpop.f32.mrb[7].mxu0  ;;  %v887_v23 = vpop.f32.mrb[7].mxu1 }
 0x455   :  { %v894_v24 = vcombine.low %v814_v3, %v816_v21  ;;  %v895_v28 = vcombine.low %v885_v15, %v887_v23 }
 0x457   :  { %v902_v29 = vrot.slane %v894_v24, %v2945_v59  ;;  %v909_v30 = vrot.slane %v895_v28, %v2945_v59 }
 0x459   :  { %v910_v32 = vcombine.low %v902_v29, %v909_v30 }
 0x45b   :  { %v917_v38 = vrot.slane %v910_v32, %v2945_v59 }
 0x45d   :  { %v919_v41 = vadd.f32 %v917_v38, %v747_v33 }
 0x45f   :  { %v1898_v43 = vmul.f32 -1.442695, %v919_v41  ;;  %v927_v45 = vrot.slane %v919_v41, 1  ;;  %v938_v49 = vrot.slane %v919_v41, 3  ;;  %v935_v55 = vrot.slane %v919_v41, 2 }
 0x461   :  { %2562 = vpow2.f32 %v1898_v43  ;;  %v1899_v48 = vmul.f32 -1.442695, %v927_v45  ;;  %v1900_v50 = vmul.f32 -1.442695, %v938_v49 }
 0x462   :  { %v953_v43 = vld [vmem:[#allocation5 + $0x4] ss:$8 sm:$0xf] }
 0x463   :  { %2564 = vpow2.f32 %v1899_v48 }
 0x464   :  { %2566 = vpow2.f32 %v1900_v50 }
 0x46b   :  { %v2563_v54 = vpop.eup %2562 }
 0x46c   :  { %v923_v56 = vadd.f32 1.0, %v2563_v54 }
 0x46d   :  { %v2565_v60 = vpop.eup %2564 }
 0x46e   :  { %2568 = vrcp.f32 %v923_v56  ;;  %v932_v61 = vadd.f32 1.0, %v2565_v60  ;;  %v2567_v62 = vpop.eup %2566 }
 0x46f   :  { %2570 = vtanh.f32 %v935_v55  ;;  %v943_v11 = vadd.f32 1.0, %v2567_v62 }
 0x470   :  { %2572 = vrcp.f32 %v932_v61 }
 0x471   :  { %2574 = vrcp.f32 %v943_v11 }
 0x478   :  { %v2569_v5 = vpop.eup %2568 }
 0x479   :  { %v2571_v6 = vpop.eup %2570 }
 0x47a   :  { %v2573_v10 = vpop.eup %2572  ;;  %v947_v14 = vmul.f32 %v2571_v6, %v2569_v5 }
 0x47b   :  { %v946_v12 = vmul.f32 %v2573_v10, %v3032_v58  ;;  %v2575_v15 = vpop.eup %2574 }
 0x47d   :  { %v3073_v3 = vadd.f32 %v947_v14, %v946_v12 }
 0x47f   :  { %2576 = vtanh.f32 %v3073_v3 }
 0x489   :  { %v2577_v21 = vpop.eup %2576 }
 0x48a   :  { %v950_v23 = vmul.f32 %v2577_v21, %v2575_v15 }
 0x48c   :  { %951 = vst [vmem:[#allocation4 + $0x3] sm:$0x1] %v950_v23  ;;  %1019 = vmatmul.mubr.f32.vlgmr.msra.gmra.mrb[8].mxu0 %v950_v23  ;;  %1090 = vmatmul.mubr.f32.vlgmr.msra.gmra.mrb[8].mxu1 %v950_v23 }
 0x48d   :  { %2289 = vmatpush1.bf16.msra.mxu0 %v2817_v9  ;;  %2321 = vmatpush1.bf16.msra.mxu1 %v2820_v13 }
 0x48e   :  { %2291 = vmatprep.subr.bf16.mxu0 %v2824_v17  ;;  %2323 = vmatprep.subr.bf16.mxu1 %v2826_v18 }
 0x48f   :  { %1224 = vmatprep.mubr.f32.mxu0 %v2743_v0  ;;  %1295 = vmatprep.mubr.f32.mxu1 %v2743_v0 }
 0x491   :  { %2293 = vmatpush1.bf16.msra.mxu0 %v2829_v22  ;;  %2325 = vmatpush1.bf16.msra.mxu1 %v2833_v26 }
 0x492   :  { %2295 = vmatprep.subr.bf16.mxu0 %v2835_v27  ;;  %2327 = vmatprep.subr.bf16.mxu1 %v2837_v31 }
 0x495   :  { %2297 = vmatpush1.bf16.msra.mxu0 %v2840_v35  ;;  %2329 = vmatpush1.bf16.msra.mxu1 %v2844_v39 }
 0x496   :  { %2299 = vmatprep.subr.bf16.mxu0 %v2846_v40  ;;  %2331 = vmatprep.subr.bf16.mxu1 %v2849_v44 }
 0x499   :  { %2301 = vmatpush1.bf16.msra.mxu0 %v2852_v51  ;;  %2333 = vmatpush1.bf16.msra.mxu1 %v2856_v52 }
 0x49a   :  { %2303 = vmatprep.subr.bf16.mxu0 %v2858_v53  ;;  %2335 = vmatprep.subr.bf16.mxu1 %v2861_v57 }
 0x49d   :  { %2305 = vmatpush1.bf16.msra.mxu0 %v2864_v63  ;;  %2337 = vmatpush1.bf16.msra.mxu1 %v2868_v1 }
 0x49e   :  { %2307 = vmatprep.subr.bf16.mxu0 %v2870_v2  ;;  %2339 = vmatprep.subr.bf16.mxu1 %v2873_v7 }
 0x4a1   :  { %2309 = vmatpush1.bf16.msra.mxu0 %v2876_v16  ;;  %2341 = vmatpush1.bf16.msra.mxu1 %v2880_v19 }
 0x4a2   :  { %2311 = vmatprep.subr.bf16.mxu0 %v2882_v20  ;;  %2343 = vmatprep.subr.bf16.mxu1 %v2885_v25 }
 0x4a5   :  { %2313 = vmatpush1.bf16.msra.mxu0 %v2888_v34  ;;  %2345 = vmatpush1.bf16.msra.mxu1 %v2892_v36 }
 0x4a6   :  { %2315 = vmatprep.subr.bf16.mxu0 %v2894_v37  ;;  %2347 = vmatprep.subr.bf16.mxu1 %v2897_v42 }
 0x4a9   :  { %2317 = vmatpush1.bf16.msra.mxu0 %v2900_v46  ;;  %2349 = vmatpush1.bf16.msra.mxu1 %v2904_v47 }
 0x4aa   :  { %2351 = vmatprep.subr.bf16.mxu0 %v2813_v4  ;;  %2383 = vmatprep.subr.bf16.mxu1 %v2815_v8 }
 0x55f   :  { %v1020_v58 = vpop.f32.mrb[8].mxu0  ;;  %v1091_v24 = vpop.f32.mrb[8].mxu1 }
 0x560   :  { %v1022_v28 = vpop.f32.mrb[9].mxu0  ;;  %v1093_v29 = vpop.f32.mrb[9].mxu1 }
 0x561   :  { %v1100_v30 = vcombine.low %v1020_v58, %v1022_v28  ;;  %v1101_v32 = vcombine.low %v1091_v24, %v1093_v29 }
 0x563   :  { %v1108_v33 = vrot.slane %v1100_v30, %v2945_v59  ;;  %v1115_v38 = vrot.slane %v1101_v32, %v2945_v59 }
 0x565   :  { %v1116_v41 = vcombine.low %v1108_v33, %v1115_v38 }
 0x567   :  { %v1123_v45 = vrot.slane %v1116_v41, %v2945_v59 }
 0x569   :  { %v1125_v48 = vadd.f32 %v1123_v45, %v953_v43 }
 0x56b   :  { %v1901_v49 = vmul.f32 -1.442695, %v1125_v48  ;;  %v1133_v50 = vrot.slane %v1125_v48, 1  ;;  %v1144_v55 = vrot.slane %v1125_v48, 3  ;;  %v1141_v61 = vrot.slane %v1125_v48, 2 }
 0x56d   :  { %2578 = vpow2.f32 %v1901_v49  ;;  %v1902_v54 = vmul.f32 -1.442695, %v1133_v50  ;;  %v1903_v56 = vmul.f32 -1.442695, %v1144_v55 }
 0x56e   :  { %v1159_v49 = vld [vmem:[#allocation5 + $0x5] ss:$8 sm:$0xf] }
 0x56f   :  { %2580 = vpow2.f32 %v1902_v54 }
 0x570   :  { %2582 = vpow2.f32 %v1903_v56 }
 0x577   :  { %v2579_v60 = vpop.eup %2578 }
 0x578   :  { %v1129_v62 = vadd.f32 1.0, %v2579_v60 }
 0x579   :  { %v2581_v5 = vpop.eup %2580 }
 0x57a   :  { %2584 = vrcp.f32 %v1129_v62  ;;  %v1138_v6 = vadd.f32 1.0, %v2581_v5  ;;  %v2583_v10 = vpop.eup %2582 }
 0x57b   :  { %2586 = vtanh.f32 %v1141_v61  ;;  %v1149_v15 = vadd.f32 1.0, %v2583_v10 }
 0x57c   :  { %2588 = vrcp.f32 %v1138_v6 }
 0x57d   :  { %2590 = vrcp.f32 %v1149_v15 }
 0x584   :  { %v2585_v11 = vpop.eup %2584 }
 0x585   :  { %v2587_v12 = vpop.eup %2586 }
 0x586   :  { %v2589_v14 = vpop.eup %2588  ;;  %v1153_v23 = vmul.f32 %v2587_v12, %v2585_v11 }
 0x587   :  { %v1152_v21 = vmul.f32 %v2589_v14, %v3073_v3  ;;  %v2591_v24 = vpop.eup %2590 }
 0x589   :  { %v3114_v58 = vadd.f32 %v1153_v23, %v1152_v21 }
 0x58b   :  { %2592 = vtanh.f32 %v3114_v58 }
 0x595   :  { %v2593_v28 = vpop.eup %2592 }
 0x596   :  { %v1156_v29 = vmul.f32 %v2593_v28, %v2591_v24 }
 0x598   :  { %1157 = vst [vmem:[#allocation4 + $0x4] sm:$0x1] %v1156_v29  ;;  %1225 = vmatmul.mubr.f32.vlgmr.msra.gmra.mrb[10].mxu0 %v1156_v29  ;;  %1296 = vmatmul.mubr.f32.vlgmr.msra.gmra.mrb[10].mxu1 %v1156_v29 }
 0x599   :  { %2353 = vmatpush1.bf16.msra.mxu0 %v2817_v9  ;;  %2385 = vmatpush1.bf16.msra.mxu1 %v2820_v13 }
 0x59a   :  { %2355 = vmatprep.subr.bf16.mxu0 %v2824_v17  ;;  %2387 = vmatprep.subr.bf16.mxu1 %v2826_v18 }
 0x59b   :  { %1430 = vmatprep.mubr.f32.mxu0 %v2743_v0  ;;  %1501 = vmatprep.mubr.f32.mxu1 %v2743_v0 }
 0x59d   :  { %2357 = vmatpush1.bf16.msra.mxu0 %v2829_v22  ;;  %2389 = vmatpush1.bf16.msra.mxu1 %v2833_v26 }
 0x59e   :  { %2359 = vmatprep.subr.bf16.mxu0 %v2835_v27  ;;  %2391 = vmatprep.subr.bf16.mxu1 %v2837_v31 }
 0x5a1   :  { %2361 = vmatpush1.bf16.msra.mxu0 %v2840_v35  ;;  %2393 = vmatpush1.bf16.msra.mxu1 %v2844_v39 }
 0x5a2   :  { %2363 = vmatprep.subr.bf16.mxu0 %v2846_v40  ;;  %2395 = vmatprep.subr.bf16.mxu1 %v2849_v44 }
 0x5a5   :  { %2365 = vmatpush1.bf16.msra.mxu0 %v2852_v51  ;;  %2397 = vmatpush1.bf16.msra.mxu1 %v2856_v52 }
 0x5a6   :  { %2367 = vmatprep.subr.bf16.mxu0 %v2858_v53  ;;  %2399 = vmatprep.subr.bf16.mxu1 %v2861_v57 }
 0x5a9   :  { %2369 = vmatpush1.bf16.msra.mxu0 %v2864_v63  ;;  %2401 = vmatpush1.bf16.msra.mxu1 %v2868_v1 }
 0x5aa   :  { %2371 = vmatprep.subr.bf16.mxu0 %v2870_v2  ;;  %2403 = vmatprep.subr.bf16.mxu1 %v2873_v7 }
 0x5ad   :  { %2373 = vmatpush1.bf16.msra.mxu0 %v2876_v16  ;;  %2405 = vmatpush1.bf16.msra.mxu1 %v2880_v19 }
 0x5ae   :  { %2375 = vmatprep.subr.bf16.mxu0 %v2882_v20  ;;  %2407 = vmatprep.subr.bf16.mxu1 %v2885_v25 }
 0x5b1   :  { %2377 = vmatpush1.bf16.msra.mxu0 %v2888_v34  ;;  %2409 = vmatpush1.bf16.msra.mxu1 %v2892_v36 }
 0x5b2   :  { %2379 = vmatprep.subr.bf16.mxu0 %v2894_v37  ;;  %2411 = vmatprep.subr.bf16.mxu1 %v2897_v42 }
 0x5b5   :  { %2381 = vmatpush1.bf16.msra.mxu0 %v2900_v46  ;;  %2413 = vmatpush1.bf16.msra.mxu1 %v2904_v47 }
 0x5b6   :  { %2415 = vmatprep.subr.bf16.mxu0 %v2813_v4  ;;  %2447 = vmatprep.subr.bf16.mxu1 %v2815_v8 }
 0x66b   :  { %v1226_v3 = vpop.f32.mrb[10].mxu0  ;;  %v1297_v30 = vpop.f32.mrb[10].mxu1 }
 0x66c   :  { %v1228_v32 = vpop.f32.mrb[11].mxu0  ;;  %v1299_v33 = vpop.f32.mrb[11].mxu1 }
 0x66d   :  { %v1306_v38 = vcombine.low %v1226_v3, %v1228_v32  ;;  %v1307_v41 = vcombine.low %v1297_v30, %v1299_v33 }
 0x66f   :  { %v1314_v43 = vrot.slane %v1306_v38, %v2945_v59  ;;  %v1321_v45 = vrot.slane %v1307_v41, %v2945_v59  ;;  %v1779_v38 = vld [vmem:[#allocation10] sm:$0xff]  ;;  %v1780_v41 = vld [vmem:[#allocation10 + $0x8] sm:$0xff] }
 0x671   :  { %v1322_v48 = vcombine.low %v1314_v43, %v1321_v45  ;;  %v2479_v43 = vpack.c.bf16 %v1780_v41, %v1779_v38  ;;  %v2745_v45 = vmov 0.0|0.0  }
 0x673   :  { %v1329_v50 = vrot.slane %v1322_v48, %v2945_v59  ;;  %v1781_v48 = vld [vmem:[#allocation10 + $0x10] sm:$0xff] }
 0x675   :  { %v1331_v54 = vadd.f32 %v1329_v50, %v1159_v49  ;;  %v1782_v49 = vld [vmem:[#allocation10 + $0x18] sm:$0xff] }
 0x676   :  { %v2482_v50 = vpack.c.bf16 %v1782_v49, %v1781_v48 }
 0x677   :  { %v1904_v55 = vmul.f32 -1.442695, %v1331_v54  ;;  %v1339_v56 = vrot.slane %v1331_v54, 1  ;;  %v1350_v8 = vrot.slane %v1331_v54, 3  ;;  %v1347_v62 = vrot.slane %v1331_v54, 2  ;;  %v1783_v54 = vld [vmem:[#allocation10 + $0x20] sm:$0xff] }
 0x679   :  { %2594 = vpow2.f32 %v1904_v55  ;;  %v1905_v4 = vmul.f32 -1.442695, %v1339_v56  ;;  %v1906_v60 = vmul.f32 -1.442695, %v1350_v8  ;;  %v1784_v55 = vld [vmem:[#allocation10 + $0x28] sm:$0xff]  ;;  %v1786_v8 = vld [vmem:[#allocation10 + $0x38] sm:$0xff] }
 0x67a   :  { %v2485_v56 = vpack.c.bf16 %v1784_v55, %v1783_v54 }
 0x67b   :  { %2596 = vpow2.f32 %v1905_v4  ;;  %v1785_v4 = vld [vmem:[#allocation10 + $0x30] sm:$0xff] }
 0x67c   :  { %2598 = vpow2.f32 %v1906_v60  ;;  %v2488_v60 = vpack.c.bf16 %v1786_v8, %v1785_v4 }
 0x683   :  { %v2595_v61 = vpop.eup %2594 }
 0x684   :  { %v1335_v5 = vadd.f32 1.0, %v2595_v61  ;;  %v1787_v61 = vld [vmem:[#allocation10 + $0x40] sm:$0xff] }
 0x685   :  { %v2597_v6 = vpop.eup %2596 }
 0x686   :  { %2600 = vrcp.f32 %v1335_v5  ;;  %v1344_v10 = vadd.f32 1.0, %v2597_v6  ;;  %v2599_v11 = vpop.eup %2598  ;;  %v1789_v6 = vld [vmem:[#allocation10 + $0x50] sm:$0xff] }
 0x687   :  { %2602 = vtanh.f32 %v1347_v62  ;;  %v1355_v21 = vadd.f32 1.0, %v2599_v11  ;;  %v1788_v62 = vld [vmem:[#allocation10 + $0x48] sm:$0xff] }
 0x688   :  { %2604 = vrcp.f32 %v1344_v10  ;;  %v2491_v5 = vpack.c.bf16 %v1788_v62, %v1787_v61  ;;  %v1790_v10 = vld [vmem:[#allocation10 + $0x58] sm:$0xff] }
 0x689   :  { %2606 = vrcp.f32 %v1355_v21  ;;  %v2494_v11 = vpack.c.bf16 %v1790_v10, %v1789_v6  ;;  %v1793_v21 = vld [vmem:[#allocation10 + $0x70] sm:$0xff] }
 0x690   :  { %v2601_v12 = vpop.eup %2600 }
 0x691   :  { %v2603_v14 = vpop.eup %2602 }
 0x692   :  { %v2605_v15 = vpop.eup %2604  ;;  %v1359_v24 = vmul.f32 %v2603_v14, %v2601_v12  ;;  %v1791_v12 = vld [vmem:[#allocation10 + $0x60] sm:$0xff]  ;;  %v1792_v14 = vld [vmem:[#allocation10 + $0x68] sm:$0xff] }
 0x693   :  { %v1358_v23 = vmul.f32 %v2605_v15, %v3114_v58  ;;  %v2607_v29 = vpop.eup %2606  ;;  %v2497_v15 = vpack.c.bf16 %v1792_v14, %v1791_v12 }
 0x695   :  { %v3155_v28 = vadd.f32 %v1359_v24, %v1358_v23  ;;  %v1794_v23 = vld [vmem:[#allocation10 + $0x78] sm:$0xff] }
 0x696   :  { %v2500_v24 = vpack.c.bf16 %v1794_v23, %v1793_v21 }
 0x697   :  { %2608 = vtanh.f32 %v3155_v28 }
 0x6a1   :  { %v2609_v3 = vpop.eup %2608 }
 0x6a2   :  { %v1362_v30 = vmul.f32 %v2609_v3, %v2607_v29 }
 0x6a4   :  { %1363 = vst [vmem:[#allocation4 + $0x5] sm:$0x1] %v1362_v30  ;;  %1431 = vmatmul.mubr.f32.vlgmr.msra.gmra.mrb[12].mxu0 %v1362_v30  ;;  %1502 = vmatmul.mubr.f32.vlgmr.msra.gmra.mrb[12].mxu1 %v1362_v30 }
 0x6a5   :  { %2417 = vmatpush1.bf16.msra.mxu0 %v2817_v9  ;;  %2449 = vmatpush1.bf16.msra.mxu1 %v2820_v13 }
 0x6a6   :  { %2419 = vmatprep.subr.bf16.mxu0 %v2824_v17  ;;  %2451 = vmatprep.subr.bf16.mxu1 %v2826_v18 }
 0x6a7   :  { %1636 = vmatprep.mubr.f32.mxu0 %v2743_v0  ;;  %1707 = vmatprep.mubr.f32.mxu1 %v2743_v0 }
 0x6a9   :  { %2421 = vmatpush1.bf16.msra.mxu0 %v2829_v22  ;;  %2453 = vmatpush1.bf16.msra.mxu1 %v2833_v26 }
 0x6aa   :  { %2423 = vmatprep.subr.bf16.mxu0 %v2835_v27  ;;  %2455 = vmatprep.subr.bf16.mxu1 %v2837_v31 }
 0x6ad   :  { %2425 = vmatpush1.bf16.msra.mxu0 %v2840_v35  ;;  %2457 = vmatpush1.bf16.msra.mxu1 %v2844_v39  ;;  %v1365_v39 = vld [vmem:[#allocation5 + $0x6] ss:$8 sm:$0xf] }
 0x6ae   :  { %2427 = vmatprep.subr.bf16.mxu0 %v2846_v40  ;;  %2459 = vmatprep.subr.bf16.mxu1 %v2849_v44 }
 0x6b1   :  { %2429 = vmatpush1.bf16.msra.mxu0 %v2852_v51  ;;  %2461 = vmatpush1.bf16.msra.mxu1 %v2856_v52 }
 0x6b2   :  { %2431 = vmatprep.subr.bf16.mxu0 %v2858_v53  ;;  %2463 = vmatprep.subr.bf16.mxu1 %v2861_v57 }
 0x6b5   :  { %2433 = vmatpush1.bf16.msra.mxu0 %v2864_v63  ;;  %2465 = vmatpush1.bf16.msra.mxu1 %v2868_v1 }
 0x6b6   :  { %2435 = vmatprep.subr.bf16.mxu0 %v2870_v2  ;;  %2467 = vmatprep.subr.bf16.mxu1 %v2873_v7 }
 0x6b9   :  { %2437 = vmatpush1.bf16.msra.mxu0 %v2876_v16  ;;  %2469 = vmatpush1.bf16.msra.mxu1 %v2880_v19 }
 0x6ba   :  { %2439 = vmatprep.subr.bf16.mxu0 %v2882_v20  ;;  %2471 = vmatprep.subr.bf16.mxu1 %v2885_v25 }
 0x6bd   :  { %2441 = vmatpush1.bf16.msra.mxu0 %v2888_v34  ;;  %2473 = vmatpush1.bf16.msra.mxu1 %v2892_v36 }
 0x6be   :  { %2443 = vmatprep.subr.bf16.mxu0 %v2894_v37  ;;  %2475 = vmatprep.subr.bf16.mxu1 %v2897_v42 }
 0x6c1   :  { %2445 = vmatpush1.bf16.msra.mxu0 %v2900_v46  ;;  %2477 = vmatpush1.bf16.msra.mxu1 %v2904_v47 }
 0x6c2   :  { %2478 = vmatprep.subr.bf16.mxu0 %v2745_v45 }
 0x777   :  { %v1432_v9 = vpop.f32.mrb[12].mxu0  ;;  %v1503_v13 = vpop.f32.mrb[12].mxu1 }
 0x778   :  { %v1434_v17 = vpop.f32.mrb[13].mxu0  ;;  %v1505_v18 = vpop.f32.mrb[13].mxu1 }
 0x779   :  { %v1512_v22 = vcombine.low %v1432_v9, %v1434_v17  ;;  %v1513_v26 = vcombine.low %v1503_v13, %v1505_v18 }
 0x77b   :  { %v1520_v27 = vrot.slane %v1512_v22, %v2945_v59  ;;  %v1527_v31 = vrot.slane %v1513_v26, %v2945_v59  ;;  %v1571_v26 = vld [vmem:[#allocation5 + $0x7] ss:$8 sm:$0xf] }
 0x77d   :  { %v1528_v35 = vcombine.low %v1520_v27, %v1527_v31 }
 0x77f   :  { %v1535_v40 = vrot.slane %v1528_v35, %v2945_v59 }
 0x781   :  { %v1537_v44 = vadd.f32 %v1535_v40, %v1365_v39 }
 0x783   :  { %v1907_v51 = vmul.f32 -1.442695, %v1537_v44  ;;  %v1545_v52 = vrot.slane %v1537_v44, 1  ;;  %v1556_v57 = vrot.slane %v1537_v44, 3  ;;  %v1553_v2 = vrot.slane %v1537_v44, 2 }
 0x785   :  { %2610 = vpow2.f32 %v1907_v51  ;;  %v1908_v53 = vmul.f32 -1.442695, %v1545_v52  ;;  %v1909_v63 = vmul.f32 -1.442695, %v1556_v57 }
 0x787   :  { %2612 = vpow2.f32 %v1908_v53 }
 0x788   :  { %2614 = vpow2.f32 %v1909_v63 }
 0x78f   :  { %v2611_v1 = vpop.eup %2610 }
 0x790   :  { %v1541_v7 = vadd.f32 1.0, %v2611_v1 }
 0x791   :  { %v2613_v16 = vpop.eup %2612 }
 0x792   :  { %2616 = vrcp.f32 %v1541_v7  ;;  %v1550_v19 = vadd.f32 1.0, %v2613_v16  ;;  %v2615_v20 = vpop.eup %2614 }
 0x793   :  { %2618 = vtanh.f32 %v1553_v2  ;;  %v1561_v37 = vadd.f32 1.0, %v2615_v20 }
 0x794   :  { %2620 = vrcp.f32 %v1550_v19 }
 0x795   :  { %2622 = vrcp.f32 %v1561_v37 }
 0x79c   :  { %v2617_v25 = vpop.eup %2616 }
 0x79d   :  { %v2619_v34 = vpop.eup %2618 }
 0x79e   :  { %v2621_v36 = vpop.eup %2620  ;;  %v1565_v46 = vmul.f32 %v2619_v34, %v2617_v25 }
 0x79f   :  { %v1564_v42 = vmul.f32 %v2621_v36, %v3155_v28  ;;  %v2623_v58 = vpop.eup %2622 }
 0x7a1   :  { %v3194_v47 = vadd.f32 %v1565_v46, %v1564_v42  ;;  %v1913_v46 = vld [vmem:[%s3220_s3] ss:$0 sm:$0xff] }
 0x7a3   :  { %2624 = vtanh.f32 %v3194_v47 }
 0x7ad   :  { %v2625_v32 = vpop.eup %2624 }
 0x7ae   :  { %v1568_v33 = vmul.f32 %v2625_v32, %v2623_v58 }
 0x7b0   :  { %1569 = vst [vmem:[#allocation4 + $0x6] sm:$0x1] %v1568_v33  ;;  %1637 = vmatmul.mubr.f32.vlgmr.msra.gmra.mrb[14].mxu0 %v1568_v33  ;;  %1708 = vmatmul.mubr.f32.vlgmr.msra.gmra.mrb[14].mxu1 %v1568_v33 }
 0x7b1   :  { %2480 = vmatpush3.bf16.msra.mxu0 %v2479_v43  ;;  %1963 = vmatprep.mubr.msk.f32.mxu0 %vm2746_vm0, %v2743_v0 }
 0x7b2   :  { %2481 = vmatprep.subr.bf16.mxu0 %v2745_v45 }
 0x7b5   :  { %2483 = vmatpush3.bf16.msra.mxu0 %v2482_v50 }
 0x7b6   :  { %2484 = vmatprep.subr.bf16.mxu0 %v2745_v45 }
 0x7b9   :  { %2486 = vmatpush3.bf16.msra.mxu0 %v2485_v56 }
 0x7ba   :  { %2487 = vmatprep.subr.bf16.mxu0 %v2745_v45 }
 0x7bd   :  { %2489 = vmatpush3.bf16.msra.mxu0 %v2488_v60 }
 0x7be   :  { %2490 = vmatprep.subr.bf16.mxu0 %v2745_v45 }
 0x7c1   :  { %2492 = vmatpush3.bf16.msra.mxu0 %v2491_v5 }
 0x7c2   :  { %2493 = vmatprep.subr.bf16.mxu0 %v2745_v45 }
 0x7c5   :  { %2495 = vmatpush3.bf16.msra.mxu0 %v2494_v11 }
 0x7c6   :  { %2496 = vmatprep.subr.bf16.mxu0 %v2745_v45 }
 0x7c9   :  { %2498 = vmatpush3.bf16.msra.mxu0 %v2497_v15 }
 0x7ca   :  { %2499 = vmatprep.subr.bf16.mxu0 %v2745_v45 }
 0x7cd   :  { %2501 = vmatpush3.bf16.msra.mxu0 %v2500_v24 }
 0x883   :  { %v1638_v28 = vpop.f32.mrb[14].mxu0  ;;  %v1709_v29 = vpop.f32.mrb[14].mxu1 }
 0x884   :  { %v1640_v3 = vpop.f32.mrb[15].mxu0  ;;  %v1711_v30 = vpop.f32.mrb[15].mxu1 }
 0x885   :  { %v1718_v9 = vcombine.low %v1638_v28, %v1640_v3  ;;  %v1719_v13 = vcombine.low %v1709_v29, %v1711_v30 }
 0x887   :  { %v1726_v17 = vrot.slane %v1718_v9, %v2945_v59  ;;  %v1733_v18 = vrot.slane %v1719_v13, %v2945_v59 }
 0x889   :  { %v1734_v22 = vcombine.low %v1726_v17, %v1733_v18 }
 0x88b   :  { %v1741_v27 = vrot.slane %v1734_v22, %v2945_v59 }
 0x88d   :  { %v1743_v31 = vadd.f32 %v1741_v27, %v1571_v26 }
 0x88f   :  { %v1910_v0 = vmul.f32 -1.442695, %v1743_v31  ;;  %v1751_v35 = vrot.slane %v1743_v31, 1  ;;  %v1762_v40 = vrot.slane %v1743_v31, 3  ;;  %v1759_v52 = vrot.slane %v1743_v31, 2 }
 0x891   :  { %2626 = vpow2.f32 %v1910_v0  ;;  %v1911_v39 = vmul.f32 -1.442695, %v1751_v35  ;;  %v1912_v44 = vmul.f32 -1.442695, %v1762_v40 }
 0x893   :  { %2628 = vpow2.f32 %v1911_v39 }
 0x894   :  { %2630 = vpow2.f32 %v1912_v44 }
 0x89b   :  { %v2627_v51 = vpop.eup %2626 }
 0x89c   :  { %v1747_v53 = vadd.f32 1.0, %v2627_v51 }
 0x89d   :  { %v2629_v57 = vpop.eup %2628 }
 0x89e   :  { %2632 = vrcp.f32 %v1747_v53  ;;  %v1756_v63 = vadd.f32 1.0, %v2629_v57  ;;  %v2631_v1 = vpop.eup %2630 }
 0x89f   :  { %2634 = vtanh.f32 %v1759_v52  ;;  %v1767_v16 = vadd.f32 1.0, %v2631_v1 }
 0x8a0   :  { %2636 = vrcp.f32 %v1756_v63 }
 0x8a1   :  { %2638 = vrcp.f32 %v1767_v16 }
 0x8a8   :  { %v2633_v2 = vpop.eup %2632 }
 0x8a9   :  { %v2635_v59 = vpop.eup %2634 }
 0x8aa   :  { %v2637_v7 = vpop.eup %2636  ;;  %v1771_v20 = vmul.f32 %v2635_v59, %v2633_v2 }
 0x8ab   :  { %v1770_v19 = vmul.f32 %v2637_v7, %v3194_v47  ;;  %v2639_v34 = vpop.eup %2638 }
 0x8ad   :  { %v1772_v25 = vadd.f32 %v1771_v20, %v1770_v19 }
 0x8af   :  { %2640 = vtanh.f32 %v1772_v25  ;;  %1777 = vst [vmem:[#allocation3] sm:$0x1] %v1772_v25 }
 0x8b9   :  { %v2641_v36 = vpop.eup %2640 }
 0x8ba   :  { %v1774_v37 = vmul.f32 %v2641_v36, %v2639_v34 }
 0x8bc   :  { %1775 = vst [vmem:[#allocation4 + $0x7] sm:$0x1] %v1774_v37  ;;  %1776 = vst [vmem:[#allocation2] sm:$0x1] %v1774_v37 }
 0x8c3   :  { %v1778_v42 = vld [vmem:[#allocation4] sm:$0xff] }
 0x8c4   :  { %1964 = vmatmul.mubr.f32.vlgmr.msra.gmra.mrb[16].mxu0 %v1778_v42 }
 0x997   :  { %v1868_v58 = vpop.f32.mrb[16].mxu0 }
 0x998   :  { %v1869_v47 = vadd.f32 %v1913_v46, %v1868_v58  ;;  %v1965_v32 = vpop.f32.mrb[17].mxu0 }
 0x99a   :  { %1872 = vst [vmem:[#allocation11] sm:$0xff] %v1869_v47 }
 0x99b   :  { %2719 = shalt.err (!%p2716_p0)
}
 0x99c   :  { %s2720_s7 = scalar_lea.hbm %s3221_s4, 128 }
 0x99d   :  { %p2721_p1 = scmp.ne.s32.totalorder %s3221_s4, %s2720_s7  ;;  %p2724_p2 = scmp.lt.u32.totalorder %s2720_s7, %s3221_s4 }
 0x99f   :  { %p2726_p3 = pnand %p2724_p2, %p2721_p1 }
 0x9a1   :  { %2729 = shalt.err (!%p2726_p3)
}
 0x9a2   :  { %1882 = dma.vmem_to_hbm [thread:$0]  %s1880_s29, 128, %s3221_s4, [#allocation7]  }
 0x9a3   :  { %2734 = dma.done.wait [#allocation7], 128  }
 0x9a4   :  { %2735 = vsyncadd [#allocation7], 4294967168 }
 0x9a5   :  { %1886 = vsyncpa [#allocation6], 1 }
 0x9a6   :  { %1887 = vsyncpa [#allocation9], 1 }
 0x9a7   :  { %1888 = vsyncpa [#allocation7], 1 }

</bundles_post_ra>
